<compile_context>
chip_gen: v7x
topology: tpu7x:2x2x1
jax: 0.10.0
libtpu: 0.0.40
codegen_flags: <defaults>
</compile_context>

<pallas_src>
import math
from functools import partial

import jax
import jax.numpy as jnp
from jax import lax
from jax.experimental import pallas as pl
from jax.experimental.pallas import tpu as pltpu

LN_EPS = 1e-5


def _combination_kernel(q_ref, k_ref, v_ref,
                        wq_ref, bq_ref, wk_ref, bk_ref, wv_ref, bv_ref,
                        wo_ref, bo_ref, gamma_ref, beta_ref,
                        o_ref, kproj_ref, vproj_ref, *, n_heads, d_k):
    f32 = jnp.float32
    bf16 = jnp.bfloat16
    t = pl.program_id(1)

    # --- K/V projections: once per batch element, persisted in bf16 VMEM scratch across the
    #     (arbitrary) seq-tile axis. bf16 operands, f32 accumulation, f32 bias add.
    @pl.when(t == 0)
    def _project_kv():
        xk = k_ref[0]                                              # (S, D) bf16
        xv = v_ref[0]                                              # (S, D) bf16
        kproj = jnp.dot(xk, wk_ref[...], preferred_element_type=f32) + bk_ref[...].astype(f32)
        vproj = jnp.dot(xv, wv_ref[...], preferred_element_type=f32) + bv_ref[...].astype(f32)
        kproj_ref[...] = kproj.astype(bf16)
        vproj_ref[...] = vproj.astype(bf16)

    # --- Q projection for this row tile. Wq/bq already carry the 1/sqrt(d_k) scale.
    xq = q_ref[0].astype(f32)                                      # (TQ, D) residual too
    q = jnp.dot(xq.astype(bf16), wq_ref[...],
                preferred_element_type=f32) + bq_ref[...].astype(f32)
    q16 = q.astype(bf16)

    kp = kproj_ref[...]                                            # (S, D) bf16
    vp = vproj_ref[...]                                            # (S, D) bf16

    # --- per-head scaled-dot-product combination (static unroll; n_heads is tiny).
    # TODO(synk): for long S, bound the live (TQ, S) score block with flash-style KV tiling.
    ctxs = []
    for head in range(n_heads):
        sl = slice(head * d_k, (head + 1) * d_k)
        qh = q16[:, sl]                                            # (TQ, d_k) bf16
        kh = kp[:, sl]                                             # (S,  d_k) bf16
        vh = vp[:, sl]                                             # (S,  d_k) bf16

        scores = lax.dot_general(qh, kh, (((1,), (1,)), ((), ())),
                                 preferred_element_type=f32)       # (TQ, S) f32
        m = jnp.max(scores, axis=-1, keepdims=True)
        e = jnp.exp(scores - m)
        p = e * pl.reciprocal(jnp.sum(e, axis=-1, keepdims=True), approx=True)
        # TODO(synk): attention-prob dropout is identity here (eval semantics).
        ctxs.append(jnp.dot(p.astype(bf16), vh, preferred_element_type=f32))   # (TQ, d_k)

    # --- single D-contraction output projection (one big MXU matmul instead of n_heads).
    ctx_all = jnp.concatenate(ctxs, axis=-1)                       # (TQ, D) f32
    out = jnp.dot(ctx_all.astype(bf16), wo_ref[...], preferred_element_type=f32)

    # --- bias + dropout(identity) + residual, then LayerNorm — all f32.
    z = out + bo_ref[...].astype(f32) + xq
    mean = jnp.mean(z, axis=-1, keepdims=True)
    zc = z - mean
    var = jnp.mean(zc * zc, axis=-1, keepdims=True)
    inv = lax.rsqrt(var + LN_EPS)                                  # EUP, fused with gamma
    o_ref[0] = (zc * (inv * gamma_ref[...].astype(f32))
                + beta_ref[...].astype(f32)).astype(o_ref.dtype)


def _vmem_capacity_bytes():
    try:
        return int(pltpu.get_tpu_info().vmem_capacity_bytes)
    except Exception:
        return 64 * 1024 * 1024  # conservative (v7x-sized) fallback


def _pick_row_tile(seq_len, max_tile):
    """Largest tile <= max_tile that evenly divides seq_len (multiple of 8 if possible)."""
    for tile in range(min(seq_len, max_tile), 0, -1):
        if seq_len % tile == 0 and (tile % 8 == 0 or tile == seq_len):
            return tile
    return seq_len


def combination_forward(query, key, value, params, *, n_heads, row_tile=None):
    """Fused Combination forward. query/key/value: (B, S, D) f32; params from init_params."""
    wq, bq, wk, bk, wv, bv, wo, bo, gamma, beta = params
    B, S, D = query.shape
    assert D % n_heads == 0, "d_model must be divisible by h"
    d_k = D // n_heads
    assert D % 128 == 0, "d_model should be a multiple of 128 (lane axis)"
    assert S % 8 == 0, "sequence length should be a multiple of 8 (sublane axis)"

    # Per-generation VMEM budget / tile size (v5e/v6e: 128 MiB physical -> 96 MiB, big TQ;
    # v7x: 64 MiB physical -> 48 MiB, smaller TQ).
    vmem_cap = _vmem_capacity_bytes()
    vmem_limit = min(vmem_cap * 3 // 4, 100 * 1024 * 1024)
    max_tile = 1024 if vmem_cap >= (100 << 20) else 512

    tq = row_tile or _pick_row_tile(S, max_tile)
    assert S % tq == 0
    grid = (B, S // tq)  # seq-tile axis innermost: constant K/V/weight block indices per batch

    # bf16 K/V inputs: identical numerics to the in-kernel cast, half the pipelined footprint.
    key_bf16 = key.astype(jnp.bfloat16)
    value_bf16 = value.astype(jnp.bfloat16)

    kernel = partial(_combination_kernel, n_heads=n_heads, d_k=d_k)

    const = lambda b, t: (0, 0)          # weights / biases / LN params: same block always
    full_seq = lambda b, t: (b, 0, 0)    # key / value: full sequence per batch element
    q_tile = lambda b, t: (b, t, 0)      # query / output: tiled along token rows

    # Advisory cost estimate (per full call): 4 DxD projections + 2 attention matmuls.
    flops = 8 * B * S * D * D + 4 * B * S * S * D
    transcendentals = B * n_heads * S * S + 2 * B * S
    bytes_accessed = (B * S * D * 4          # query (f32)
                      + 2 * B * S * D * 2    # key/value (bf16)
                      + B * S * D * 4        # output (f32)
                      + 4 * D * D * 2        # weights (bf16)
                      + 6 * D * 4)           # biases + LN params (f32)

    return pl.pallas_call(
        kernel,
        out_shape=jax.ShapeDtypeStruct((B, S, D), query.dtype),
        grid_spec=pltpu.PrefetchScalarGridSpec(
            num_scalar_prefetch=0,
            grid=grid,
            in_specs=[
                pl.BlockSpec((1, tq, D), q_tile),   # query (also residual)
                pl.BlockSpec((1, S, D), full_seq),  # key   (bf16)
                pl.BlockSpec((1, S, D), full_seq),  # value (bf16)
                pl.BlockSpec((D, D), const),        # Wq  (in, out) bf16, 1/sqrt(d_k) folded
                pl.BlockSpec((1, D), const),        # bq  (scaled)
                pl.BlockSpec((D, D), const),        # Wk
                pl.BlockSpec((1, D), const),        # bk
                pl.BlockSpec((D, D), const),        # Wv
                pl.BlockSpec((1, D), const),        # bv
                pl.BlockSpec((D, D), const),        # Wo
                pl.BlockSpec((1, D), const),        # bo
                pl.BlockSpec((1, D), const),        # gamma
                pl.BlockSpec((1, D), const),        # beta
            ],
            out_specs=pl.BlockSpec((1, tq, D), q_tile),
            scratch_shapes=[
                pltpu.VMEM((S, D), jnp.bfloat16),   # projected K (persists across seq tiles)
                pltpu.VMEM((S, D), jnp.bfloat16),   # projected V
            ],
        ),
        compiler_params=pltpu.CompilerParams(
            # seq-tile axis must be "arbitrary": projected K/V in scratch carry across tiles.
            dimension_semantics=("parallel", "arbitrary"),
            vmem_limit_bytes=int(vmem_limit),
        ),
        cost_estimate=pl.CostEstimate(
            flops=int(flops),
            transcendentals=int(transcendentals),
            bytes_accessed=int(bytes_accessed),
        ),
    )(query, key_bf16, value_bf16, wq, bq, wk, bk, wv, bv, wo, bo, gamma, beta)


def init_params(key, d_model, n_heads):
    """nn.Linear-style uniform(-1/sqrt(fan_in), 1/sqrt(fan_in)) init.

    Weights are pre-transposed to (in, out) and stored bf16 (MXU dtype); biases and
    LayerNorm affine parameters stay f32. The 1/sqrt(d_k) attention scale is folded
    into Wq/bq (mathematically identical to dividing the scores by sqrt(d_k)).
    """
    ks = jax.random.split(key, 8)
    bound = 1.0 / math.sqrt(d_model)
    d_k = d_model // n_heads
    scale = 1.0 / math.sqrt(d_k)

    def linear(kw, kb, prescale=1.0):
        w = jax.random.uniform(kw, (d_model, d_model), jnp.float32, -bound, bound)
        b = jax.random.uniform(kb, (1, d_model), jnp.float32, -bound, bound)
        return (w * prescale).astype(jnp.bfloat16), b * prescale

    wq, bq = linear(ks[0], ks[1], prescale=scale)   # attention scale folded in
    wk, bk = linear(ks[2], ks[3])
    wv, bv = linear(ks[4], ks[5])
    wo, bo = linear(ks[6], ks[7])
    gamma = jnp.ones((1, d_model), jnp.float32)
    beta = jnp.zeros((1, d_model), jnp.float32)
    return wq, bq, wk, bk, wv, bv, wo, bo, gamma, beta


def _reference(query, key, value, params, *, n_heads):
    """Pure-JAX reference (f32 HIGHEST attention). Params carry the folded 1/sqrt(d_k)
    scale in Wq/bq, so no extra score scaling is applied here."""
    wq, bq, wk, bk, wv, bv, wo, bo, gamma, beta = params
    B, S, D = query.shape
    d_k = D // n_heads
    bf16 = jnp.bfloat16

    def proj(x, w, b):
        return jnp.dot(x.astype(bf16), w, preferred_element_type=jnp.float32) + b

    def split_heads(x):
        return x.reshape(B, S, n_heads, d_k).transpose(0, 2, 1, 3)

    q = split_heads(proj(query, wq, bq))
    k = split_heads(proj(key, wk, bk))
    v = split_heads(proj(value, wv, bv))

    scores = jnp.einsum("bhqd,bhkd->bhqk", q, k, precision=lax.Precision.HIGHEST)
    p = jax.nn.softmax(scores, axis=-1)
    ctx = jnp.einsum("bhqk,bhkd->bhqd", p, v, precision=lax.Precision.HIGHEST)
    ctx = ctx.transpose(0, 2, 1, 3).reshape(B, S, D)

    out = jnp.dot(ctx.astype(bf16), wo, preferred_element_type=jnp.float32) + bo
    z = out + query
    mean = jnp.mean(z, axis=-1, keepdims=True)
    var = jnp.mean((z - mean) ** 2, axis=-1, keepdims=True)
    return (z - mean) / jnp.sqrt(var + LN_EPS) * gamma + beta


if __name__ == "__main__":
    root = jax.random.PRNGKey(0)
    kq, kk, kv, kp = jax.random.split(root, 4)

    batch, seq, d_model, n_heads = 2, 16, 128, 4
    query = jax.random.normal(kq, (batch, seq, d_model), jnp.float32)
    key_t = jax.random.normal(kk, (batch, seq, d_model), jnp.float32)
    value = jax.random.normal(kv, (batch, seq, d_model), jnp.float32)
    params = init_params(kp, d_model, n_heads)

    out = combination_forward(query, key_t, value, params, n_heads=n_heads)
    out = jax.block_until_ready(out)

    ref = _reference(query, key_t, value, params, n_heads=n_heads)
    assert out.shape == query.shape
    max_err = float(jnp.max(jnp.abs(out - ref)))
    assert jnp.allclose(out, ref, atol=2e-2, rtol=2e-2), (
        f"mismatch vs reference (max err {max_err})")

    print("KERNEL_OK")
</pallas_src>

<mosaic_0001>
module attributes {stable_mosaic.version = 11 : i64} {
  func.func @_combination_kernel(%arg0: i32, %arg1: i32, %arg2: memref<1x16x128xf32, #tpu.memory_space<vmem>>, %arg3: memref<1x16x128xbf16, #tpu.memory_space<vmem>>, %arg4: memref<1x16x128xbf16, #tpu.memory_space<vmem>>, %arg5: memref<128x128xbf16, #tpu.memory_space<vmem>>, %arg6: memref<1x128xf32, #tpu.memory_space<vmem>>, %arg7: memref<128x128xbf16, #tpu.memory_space<vmem>>, %arg8: memref<1x128xf32, #tpu.memory_space<vmem>>, %arg9: memref<128x128xbf16, #tpu.memory_space<vmem>>, %arg10: memref<1x128xf32, #tpu.memory_space<vmem>>, %arg11: memref<128x128xbf16, #tpu.memory_space<vmem>>, %arg12: memref<1x128xf32, #tpu.memory_space<vmem>>, %arg13: memref<1x128xf32, #tpu.memory_space<vmem>>, %arg14: memref<1x128xf32, #tpu.memory_space<vmem>>, %arg15: memref<1x16x128xf32, #tpu.memory_space<vmem>>, %arg16: memref<16x128xbf16, #tpu.memory_space<vmem>>, %arg17: memref<16x128xbf16, #tpu.memory_space<vmem>>) attributes {dimension_semantics = [#tpu.dimension_semantics<parallel>, #tpu.dimension_semantics<arbitrary>], iteration_bounds = array<i64: 2, 1>, scalar_prefetch = 0 : i64, scratch_operands = 2 : i64, tpu.core_type = #tpu.core_type<tc>, window_params = [{transform_indices = @transform_0, window_bounds = array<i64: 1, 16, 128>}, {transform_indices = @transform_1, window_bounds = array<i64: 1, 16, 128>}, {transform_indices = @transform_2, window_bounds = array<i64: 1, 16, 128>}, {pipeline_mode = #tpu.pipeline_mode<synchronous>, transform_indices = @transform_3, window_bounds = array<i64: 128, 128>}, {pipeline_mode = #tpu.pipeline_mode<synchronous>, transform_indices = @transform_4, window_bounds = array<i64: 1, 128>}, {pipeline_mode = #tpu.pipeline_mode<synchronous>, transform_indices = @transform_5, window_bounds = array<i64: 128, 128>}, {pipeline_mode = #tpu.pipeline_mode<synchronous>, transform_indices = @transform_6, window_bounds = array<i64: 1, 128>}, {pipeline_mode = #tpu.pipeline_mode<synchronous>, transform_indices = @transform_7, window_bounds = array<i64: 128, 128>}, {pipeline_mode = #tpu.pipeline_mode<synchronous>, transform_indices = @transform_8, window_bounds = array<i64: 1, 128>}, {pipeline_mode = #tpu.pipeline_mode<synchronous>, transform_indices = @transform_9, window_bounds = array<i64: 128, 128>}, {pipeline_mode = #tpu.pipeline_mode<synchronous>, transform_indices = @transform_10, window_bounds = array<i64: 1, 128>}, {pipeline_mode = #tpu.pipeline_mode<synchronous>, transform_indices = @transform_11, window_bounds = array<i64: 1, 128>}, {pipeline_mode = #tpu.pipeline_mode<synchronous>, transform_indices = @transform_12, window_bounds = array<i64: 1, 128>}, {transform_indices = @transform_13, window_bounds = array<i64: 1, 16, 128>}]} {
    %c0_i32 = arith.constant 0 : i32
    %0 = arith.cmpi eq, %arg1, %c0_i32 : i32
    %1 = arith.extui %0 : i1 to i32
    %c0_i32_0 = arith.constant 0 : i32
    %2 = arith.cmpi ne, %1, %c0_i32_0 : i32
    scf.if %2 {
      %c0_44 = arith.constant 0 : index
      %c0_45 = arith.constant 0 : index
      %c0_46 = arith.constant 0 : index
      %111 = vector.load %arg3[%c0_44, %c0_45, %c0_46] : memref<1x16x128xbf16, #tpu.memory_space<vmem>>, vector<1x16x128xbf16>
      %112 = vector.shape_cast %111 : vector<1x16x128xbf16> to vector<16x128xbf16>
      %c0_47 = arith.constant 0 : index
      %c0_48 = arith.constant 0 : index
      %c0_49 = arith.constant 0 : index
      %113 = vector.load %arg4[%c0_47, %c0_48, %c0_49] : memref<1x16x128xbf16, #tpu.memory_space<vmem>>, vector<1x16x128xbf16>
      %114 = vector.shape_cast %113 : vector<1x16x128xbf16> to vector<16x128xbf16>
      %c0_50 = arith.constant 0 : index
      %c0_51 = arith.constant 0 : index
      %115 = vector.load %arg7[%c0_50, %c0_51] : memref<128x128xbf16, #tpu.memory_space<vmem>>, vector<128x128xbf16>
      %cst_52 = arith.constant dense<0.000000e+00> : vector<16x128xf32>
      %116 = tpu.matmul %112, %115, %cst_52 {dimension_numbers = #tpu.dot_dimension_numbers<[1], [0], [0], [1], [0, 0, 1, 1], [], []>} : vector<16x128xbf16>, vector<128x128xbf16>, vector<16x128xf32> -> vector<16x128xf32>
      %c0_53 = arith.constant 0 : index
      %c0_54 = arith.constant 0 : index
      %117 = vector.load %arg8[%c0_53, %c0_54] : memref<1x128xf32, #tpu.memory_space<vmem>>, vector<1x128xf32>
      %118 = vector.broadcast %117 : vector<1x128xf32> to vector<16x128xf32>
      %119 = arith.addf %116, %118 : vector<16x128xf32>
      %c0_55 = arith.constant 0 : index
      %c0_56 = arith.constant 0 : index
      %120 = vector.load %arg9[%c0_55, %c0_56] : memref<128x128xbf16, #tpu.memory_space<vmem>>, vector<128x128xbf16>
      %cst_57 = arith.constant dense<0.000000e+00> : vector<16x128xf32>
      %121 = tpu.matmul %114, %120, %cst_57 {dimension_numbers = #tpu.dot_dimension_numbers<[1], [0], [0], [1], [0, 0, 1, 1], [], []>} : vector<16x128xbf16>, vector<128x128xbf16>, vector<16x128xf32> -> vector<16x128xf32>
      %c0_58 = arith.constant 0 : index
      %c0_59 = arith.constant 0 : index
      %122 = vector.load %arg10[%c0_58, %c0_59] : memref<1x128xf32, #tpu.memory_space<vmem>>, vector<1x128xf32>
      %123 = vector.broadcast %122 : vector<1x128xf32> to vector<16x128xf32>
      %124 = arith.addf %121, %123 : vector<16x128xf32>
      %125 = arith.truncf %119 : vector<16x128xf32> to vector<16x128xbf16>
      %c0_60 = arith.constant 0 : index
      %c0_61 = arith.constant 0 : index
      %126 = vector.load %arg16[%c0_60, %c0_61] : memref<16x128xbf16, #tpu.memory_space<vmem>>, vector<16x128xbf16>
      tpu.vector_store %arg16[%c0_60, %c0_61], %125 {strides = array<i32>} : memref<16x128xbf16, #tpu.memory_space<vmem>>, vector<16x128xbf16>,
      %127 = arith.truncf %124 : vector<16x128xf32> to vector<16x128xbf16>
      %c0_62 = arith.constant 0 : index
      %c0_63 = arith.constant 0 : index
      %128 = vector.load %arg17[%c0_62, %c0_63] : memref<16x128xbf16, #tpu.memory_space<vmem>>, vector<16x128xbf16>
      tpu.vector_store %arg17[%c0_62, %c0_63], %127 {strides = array<i32>} : memref<16x128xbf16, #tpu.memory_space<vmem>>, vector<16x128xbf16>,
    } else {
    }
    %c0 = arith.constant 0 : index
    %c0_1 = arith.constant 0 : index
    %c0_2 = arith.constant 0 : index
    %3 = vector.load %arg2[%c0, %c0_1, %c0_2] : memref<1x16x128xf32, #tpu.memory_space<vmem>>, vector<1x16x128xf32>
    %4 = vector.shape_cast %3 : vector<1x16x128xf32> to vector<16x128xf32>
    %5 = arith.truncf %4 : vector<16x128xf32> to vector<16x128xbf16>
    %c0_3 = arith.constant 0 : index
    %c0_4 = arith.constant 0 : index
    %6 = vector.load %arg5[%c0_3, %c0_4] : memref<128x128xbf16, #tpu.memory_space<vmem>>, vector<128x128xbf16>
    %cst = arith.constant dense<0.000000e+00> : vector<16x128xf32>
    %7 = tpu.matmul %5, %6, %cst {dimension_numbers = #tpu.dot_dimension_numbers<[1], [0], [0], [1], [0, 0, 1, 1], [], []>} : vector<16x128xbf16>, vector<128x128xbf16>, vector<16x128xf32> -> vector<16x128xf32>
    %c0_5 = arith.constant 0 : index
    %c0_6 = arith.constant 0 : index
    %8 = vector.load %arg6[%c0_5, %c0_6] : memref<1x128xf32, #tpu.memory_space<vmem>>, vector<1x128xf32>
    %9 = vector.broadcast %8 : vector<1x128xf32> to vector<16x128xf32>
    %10 = arith.addf %7, %9 : vector<16x128xf32>
    %11 = arith.truncf %10 : vector<16x128xf32> to vector<16x128xbf16>
    %c0_7 = arith.constant 0 : index
    %c0_8 = arith.constant 0 : index
    %12 = vector.load %arg16[%c0_7, %c0_8] : memref<16x128xbf16, #tpu.memory_space<vmem>>, vector<16x128xbf16>
    %c0_9 = arith.constant 0 : index
    %c0_10 = arith.constant 0 : index
    %13 = vector.load %arg17[%c0_9, %c0_10] : memref<16x128xbf16, #tpu.memory_space<vmem>>, vector<16x128xbf16>
    %14 = vector.extract_strided_slice %11 {offsets = [0, 0], sizes = [16, 32], strides = [1, 1]} : vector<16x128xbf16> to vector<16x32xbf16>
    %15 = vector.extract_strided_slice %12 {offsets = [0, 0], sizes = [16, 32], strides = [1, 1]} : vector<16x128xbf16> to vector<16x32xbf16>
    %16 = vector.extract_strided_slice %13 {offsets = [0, 0], sizes = [16, 32], strides = [1, 1]} : vector<16x128xbf16> to vector<16x32xbf16>
    %cst_11 = arith.constant dense<0.000000e+00> : vector<16x16xf32>
    %17 = tpu.matmul %14, %15, %cst_11 {dimension_numbers = #tpu.dot_dimension_numbers<[1], [1], [0], [0], [0, 0, 1, 0], [], []>} : vector<16x32xbf16>, vector<16x32xbf16>, vector<16x16xf32> -> vector<16x16xf32>
    %cst_12 = arith.constant dense<0xFF800000> : vector<16xf32>
    %18 = vector.multi_reduction <maximumf>, %17, %cst_12 [1] : vector<16x16xf32> to vector<16xf32>
    %19 = vector.shape_cast %18 : vector<16xf32> to vector<16x1xf32>
    %20 = vector.broadcast %19 : vector<16x1xf32> to vector<16x16xf32>
    %21 = arith.subf %17, %20 : vector<16x16xf32>
    %22 = math.exp %21 : vector<16x16xf32>
    %cst_13 = arith.constant dense<0.000000e+00> : vector<16xf32>
    %23 = vector.multi_reduction <add>, %22, %cst_13 [1] : vector<16x16xf32> to vector<16xf32>
    %24 = vector.shape_cast %23 : vector<16xf32> to vector<16x1xf32>
    %25 = tpu.reciprocal %24 {approx = true} : vector<16x1xf32> -> vector<16x1xf32>
    %26 = vector.broadcast %25 : vector<16x1xf32> to vector<16x16xf32>
    %27 = arith.mulf %22, %26 : vector<16x16xf32>
    %28 = arith.truncf %27 : vector<16x16xf32> to vector<16x16xbf16>
    %cst_14 = arith.constant dense<0.000000e+00> : vector<16x32xf32>
    %29 = tpu.matmul %28, %16, %cst_14 {dimension_numbers = #tpu.dot_dimension_numbers<[1], [0], [0], [1], [0, 0, 1, 1], [], []>} : vector<16x16xbf16>, vector<16x32xbf16>, vector<16x32xf32> -> vector<16x32xf32>
    %30 = vector.extract_strided_slice %11 {offsets = [0, 32], sizes = [16, 32], strides = [1, 1]} : vector<16x128xbf16> to vector<16x32xbf16>
    %31 = vector.extract_strided_slice %12 {offsets = [0, 32], sizes = [16, 32], strides = [1, 1]} : vector<16x128xbf16> to vector<16x32xbf16>
    %32 = vector.extract_strided_slice %13 {offsets = [0, 32], sizes = [16, 32], strides = [1, 1]} : vector<16x128xbf16> to vector<16x32xbf16>
    %cst_15 = arith.constant dense<0.000000e+00> : vector<16x16xf32>
    %33 = tpu.matmul %30, %31, %cst_15 {dimension_numbers = #tpu.dot_dimension_numbers<[1], [1], [0], [0], [0, 0, 1, 0], [], []>} : vector<16x32xbf16>, vector<16x32xbf16>, vector<16x16xf32> -> vector<16x16xf32>
    %cst_16 = arith.constant dense<0xFF800000> : vector<16xf32>
    %34 = vector.multi_reduction <maximumf>, %33, %cst_16 [1] : vector<16x16xf32> to vector<16xf32>
    %35 = vector.shape_cast %34 : vector<16xf32> to vector<16x1xf32>
    %36 = vector.broadcast %35 : vector<16x1xf32> to vector<16x16xf32>
    %37 = arith.subf %33, %36 : vector<16x16xf32>
    %38 = math.exp %37 : vector<16x16xf32>
    %cst_17 = arith.constant dense<0.000000e+00> : vector<16xf32>
    %39 = vector.multi_reduction <add>, %38, %cst_17 [1] : vector<16x16xf32> to vector<16xf32>
    %40 = vector.shape_cast %39 : vector<16xf32> to vector<16x1xf32>
    %41 = tpu.reciprocal %40 {approx = true} : vector<16x1xf32> -> vector<16x1xf32>
    %42 = vector.broadcast %41 : vector<16x1xf32> to vector<16x16xf32>
    %43 = arith.mulf %38, %42 : vector<16x16xf32>
    %44 = arith.truncf %43 : vector<16x16xf32> to vector<16x16xbf16>
    %cst_18 = arith.constant dense<0.000000e+00> : vector<16x32xf32>
    %45 = tpu.matmul %44, %32, %cst_18 {dimension_numbers = #tpu.dot_dimension_numbers<[1], [0], [0], [1], [0, 0, 1, 1], [], []>} : vector<16x16xbf16>, vector<16x32xbf16>, vector<16x32xf32> -> vector<16x32xf32>
    %46 = vector.extract_strided_slice %11 {offsets = [0, 64], sizes = [16, 32], strides = [1, 1]} : vector<16x128xbf16> to vector<16x32xbf16>
    %47 = vector.extract_strided_slice %12 {offsets = [0, 64], sizes = [16, 32], strides = [1, 1]} : vector<16x128xbf16> to vector<16x32xbf16>
    %48 = vector.extract_strided_slice %13 {offsets = [0, 64], sizes = [16, 32], strides = [1, 1]} : vector<16x128xbf16> to vector<16x32xbf16>
    %cst_19 = arith.constant dense<0.000000e+00> : vector<16x16xf32>
    %49 = tpu.matmul %46, %47, %cst_19 {dimension_numbers = #tpu.dot_dimension_numbers<[1], [1], [0], [0], [0, 0, 1, 0], [], []>} : vector<16x32xbf16>, vector<16x32xbf16>, vector<16x16xf32> -> vector<16x16xf32>
    %cst_20 = arith.constant dense<0xFF800000> : vector<16xf32>
    %50 = vector.multi_reduction <maximumf>, %49, %cst_20 [1] : vector<16x16xf32> to vector<16xf32>
    %51 = vector.shape_cast %50 : vector<16xf32> to vector<16x1xf32>
    %52 = vector.broadcast %51 : vector<16x1xf32> to vector<16x16xf32>
    %53 = arith.subf %49, %52 : vector<16x16xf32>
    %54 = math.exp %53 : vector<16x16xf32>
    %cst_21 = arith.constant dense<0.000000e+00> : vector<16xf32>
    %55 = vector.multi_reduction <add>, %54, %cst_21 [1] : vector<16x16xf32> to vector<16xf32>
    %56 = vector.shape_cast %55 : vector<16xf32> to vector<16x1xf32>
    %57 = tpu.reciprocal %56 {approx = true} : vector<16x1xf32> -> vector<16x1xf32>
    %58 = vector.broadcast %57 : vector<16x1xf32> to vector<16x16xf32>
    %59 = arith.mulf %54, %58 : vector<16x16xf32>
    %60 = arith.truncf %59 : vector<16x16xf32> to vector<16x16xbf16>
    %cst_22 = arith.constant dense<0.000000e+00> : vector<16x32xf32>
    %61 = tpu.matmul %60, %48, %cst_22 {dimension_numbers = #tpu.dot_dimension_numbers<[1], [0], [0], [1], [0, 0, 1, 1], [], []>} : vector<16x16xbf16>, vector<16x32xbf16>, vector<16x32xf32> -> vector<16x32xf32>
    %62 = vector.extract_strided_slice %11 {offsets = [0, 96], sizes = [16, 32], strides = [1, 1]} : vector<16x128xbf16> to vector<16x32xbf16>
    %63 = vector.extract_strided_slice %12 {offsets = [0, 96], sizes = [16, 32], strides = [1, 1]} : vector<16x128xbf16> to vector<16x32xbf16>
    %64 = vector.extract_strided_slice %13 {offsets = [0, 96], sizes = [16, 32], strides = [1, 1]} : vector<16x128xbf16> to vector<16x32xbf16>
    %cst_23 = arith.constant dense<0.000000e+00> : vector<16x16xf32>
    %65 = tpu.matmul %62, %63, %cst_23 {dimension_numbers = #tpu.dot_dimension_numbers<[1], [1], [0], [0], [0, 0, 1, 0], [], []>} : vector<16x32xbf16>, vector<16x32xbf16>, vector<16x16xf32> -> vector<16x16xf32>
    %cst_24 = arith.constant dense<0xFF800000> : vector<16xf32>
    %66 = vector.multi_reduction <maximumf>, %65, %cst_24 [1] : vector<16x16xf32> to vector<16xf32>
    %67 = vector.shape_cast %66 : vector<16xf32> to vector<16x1xf32>
    %68 = vector.broadcast %67 : vector<16x1xf32> to vector<16x16xf32>
    %69 = arith.subf %65, %68 : vector<16x16xf32>
    %70 = math.exp %69 : vector<16x16xf32>
    %cst_25 = arith.constant dense<0.000000e+00> : vector<16xf32>
    %71 = vector.multi_reduction <add>, %70, %cst_25 [1] : vector<16x16xf32> to vector<16xf32>
    %72 = vector.shape_cast %71 : vector<16xf32> to vector<16x1xf32>
    %73 = tpu.reciprocal %72 {approx = true} : vector<16x1xf32> -> vector<16x1xf32>
    %74 = vector.broadcast %73 : vector<16x1xf32> to vector<16x16xf32>
    %75 = arith.mulf %70, %74 : vector<16x16xf32>
    %76 = arith.truncf %75 : vector<16x16xf32> to vector<16x16xbf16>
    %cst_26 = arith.constant dense<0.000000e+00> : vector<16x32xf32>
    %77 = tpu.matmul %76, %64, %cst_26 {dimension_numbers = #tpu.dot_dimension_numbers<[1], [0], [0], [1], [0, 0, 1, 1], [], []>} : vector<16x16xbf16>, vector<16x32xbf16>, vector<16x32xf32> -> vector<16x32xf32>
    %78 = tpu.concatenate %29, %45, %61, %77 in 1 : vector<16x32xf32>, vector<16x32xf32>, vector<16x32xf32>, vector<16x32xf32> -> vector<16x128xf32>
    %79 = arith.truncf %78 : vector<16x128xf32> to vector<16x128xbf16>
    %c0_27 = arith.constant 0 : index
    %c0_28 = arith.constant 0 : index
    %80 = vector.load %arg11[%c0_27, %c0_28] : memref<128x128xbf16, #tpu.memory_space<vmem>>, vector<128x128xbf16>
    %cst_29 = arith.constant dense<0.000000e+00> : vector<16x128xf32>
    %81 = tpu.matmul %79, %80, %cst_29 {dimension_numbers = #tpu.dot_dimension_numbers<[1], [0], [0], [1], [0, 0, 1, 1], [], []>} : vector<16x128xbf16>, vector<128x128xbf16>, vector<16x128xf32> -> vector<16x128xf32>
    %c0_30 = arith.constant 0 : index
    %c0_31 = arith.constant 0 : index
    %82 = vector.load %arg12[%c0_30, %c0_31] : memref<1x128xf32, #tpu.memory_space<vmem>>, vector<1x128xf32>
    %83 = vector.broadcast %82 : vector<1x128xf32> to vector<16x128xf32>
    %84 = arith.addf %81, %83 : vector<16x128xf32>
    %85 = arith.addf %84, %4 : vector<16x128xf32>
    %cst_32 = arith.constant dense<0.000000e+00> : vector<16xf32>
    %86 = vector.multi_reduction <add>, %85, %cst_32 [1] : vector<16x128xf32> to vector<16xf32>
    %87 = vector.shape_cast %86 : vector<16xf32> to vector<16x1xf32>
    %cst_33 = arith.constant 1.280000e+02 : f32
    %88 = vector.broadcast %cst_33 : f32 to vector<16x1xf32>
    %89 = arith.divf %87, %88 : vector<16x1xf32>
    %90 = vector.broadcast %89 : vector<16x1xf32> to vector<16x128xf32>
    %91 = arith.subf %85, %90 : vector<16x128xf32>
    %92 = arith.mulf %91, %91 : vector<16x128xf32>
    %cst_34 = arith.constant dense<0.000000e+00> : vector<16xf32>
    %93 = vector.multi_reduction <add>, %92, %cst_34 [1] : vector<16x128xf32> to vector<16xf32>
    %94 = vector.shape_cast %93 : vector<16xf32> to vector<16x1xf32>
    %cst_35 = arith.constant 1.280000e+02 : f32
    %95 = vector.broadcast %cst_35 : f32 to vector<16x1xf32>
    %96 = arith.divf %94, %95 : vector<16x1xf32>
    %cst_36 = arith.constant 9.99999974E-6 : f32
    %97 = vector.broadcast %cst_36 : f32 to vector<16x1xf32>
    %98 = arith.addf %96, %97 : vector<16x1xf32>
    %99 = math.rsqrt %98 : vector<16x1xf32>
    %c0_37 = arith.constant 0 : index
    %c0_38 = arith.constant 0 : index
    %100 = vector.load %arg13[%c0_37, %c0_38] : memref<1x128xf32, #tpu.memory_space<vmem>>, vector<1x128xf32>
    %101 = vector.broadcast %99 : vector<16x1xf32> to vector<16x128xf32>
    %102 = vector.broadcast %100 : vector<1x128xf32> to vector<16x128xf32>
    %103 = arith.mulf %101, %102 : vector<16x128xf32>
    %104 = arith.mulf %91, %103 : vector<16x128xf32>
    %c0_39 = arith.constant 0 : index
    %c0_40 = arith.constant 0 : index
    %105 = vector.load %arg14[%c0_39, %c0_40] : memref<1x128xf32, #tpu.memory_space<vmem>>, vector<1x128xf32>
    %106 = vector.broadcast %105 : vector<1x128xf32> to vector<16x128xf32>
    %107 = arith.addf %104, %106 : vector<16x128xf32>
    %c0_41 = arith.constant 0 : index
    %c0_42 = arith.constant 0 : index
    %c0_43 = arith.constant 0 : index
    %108 = vector.load %arg15[%c0_41, %c0_42, %c0_43] : memref<1x16x128xf32, #tpu.memory_space<vmem>>, vector<1x16x128xf32>
    %109 = vector.shape_cast %108 : vector<1x16x128xf32> to vector<16x128xf32>
    %110 = vector.shape_cast %107 : vector<16x128xf32> to vector<1x16x128xf32>
    tpu.vector_store %arg15[%c0_41, %c0_42, %c0_43], %110 {strides = array<i32>} : memref<1x16x128xf32, #tpu.memory_space<vmem>>, vector<1x16x128xf32>,
    return
  }
  func.func @transform_0(%arg0: i32, %arg1: i32) -> (i32, i32, i32) {
    %c0_i32 = arith.constant 0 : i32
    %c0_i32_0 = arith.constant 0 : i32
    return %arg0, %arg1, %c0_i32 : i32, i32, i32
  }
  func.func @transform_1(%arg0: i32, %arg1: i32) -> (i32, i32, i32) {
    %c0_i32 = arith.constant 0 : i32
    %c0_i32_0 = arith.constant 0 : i32
    %c0_i32_1 = arith.constant 0 : i32
    return %arg0, %c0_i32, %c0_i32_0 : i32, i32, i32
  }
  func.func @transform_2(%arg0: i32, %arg1: i32) -> (i32, i32, i32) {
    %c0_i32 = arith.constant 0 : i32
    %c0_i32_0 = arith.constant 0 : i32
    %c0_i32_1 = arith.constant 0 : i32
    return %arg0, %c0_i32, %c0_i32_0 : i32, i32, i32
  }
  func.func @transform_3(%arg0: i32, %arg1: i32) -> (i32, i32) {
    %c0_i32 = arith.constant 0 : i32
    %c0_i32_0 = arith.constant 0 : i32
    %c0_i32_1 = arith.constant 0 : i32
    return %c0_i32, %c0_i32_0 : i32, i32
  }
  func.func @transform_4(%arg0: i32, %arg1: i32) -> (i32, i32) {
    %c0_i32 = arith.constant 0 : i32
    %c0_i32_0 = arith.constant 0 : i32
    %c0_i32_1 = arith.constant 0 : i32
    return %c0_i32, %c0_i32_0 : i32, i32
  }
  func.func @transform_5(%arg0: i32, %arg1: i32) -> (i32, i32) {
    %c0_i32 = arith.constant 0 : i32
    %c0_i32_0 = arith.constant 0 : i32
    %c0_i32_1 = arith.constant 0 : i32
    return %c0_i32, %c0_i32_0 : i32, i32
  }
  func.func @transform_6(%arg0: i32, %arg1: i32) -> (i32, i32) {
    %c0_i32 = arith.constant 0 : i32
    %c0_i32_0 = arith.constant 0 : i32
    %c0_i32_1 = arith.constant 0 : i32
    return %c0_i32, %c0_i32_0 : i32, i32
  }
  func.func @transform_7(%arg0: i32, %arg1: i32) -> (i32, i32) {
    %c0_i32 = arith.constant 0 : i32
    %c0_i32_0 = arith.constant 0 : i32
    %c0_i32_1 = arith.constant 0 : i32
    return %c0_i32, %c0_i32_0 : i32, i32
  }
  func.func @transform_8(%arg0: i32, %arg1: i32) -> (i32, i32) {
    %c0_i32 = arith.constant 0 : i32
    %c0_i32_0 = arith.constant 0 : i32
    %c0_i32_1 = arith.constant 0 : i32
    return %c0_i32, %c0_i32_0 : i32, i32
  }
  func.func @transform_9(%arg0: i32, %arg1: i32) -> (i32, i32) {
    %c0_i32 = arith.constant 0 : i32
    %c0_i32_0 = arith.constant 0 : i32
    %c0_i32_1 = arith.constant 0 : i32
    return %c0_i32, %c0_i32_0 : i32, i32
  }
  func.func @transform_10(%arg0: i32, %arg1: i32) -> (i32, i32) {
    %c0_i32 = arith.constant 0 : i32
    %c0_i32_0 = arith.constant 0 : i32
    %c0_i32_1 = arith.constant 0 : i32
    return %c0_i32, %c0_i32_0 : i32, i32
  }
  func.func @transform_11(%arg0: i32, %arg1: i32) -> (i32, i32) {
    %c0_i32 = arith.constant 0 : i32
    %c0_i32_0 = arith.constant 0 : i32
    %c0_i32_1 = arith.constant 0 : i32
    return %c0_i32, %c0_i32_0 : i32, i32
  }
  func.func @transform_12(%arg0: i32, %arg1: i32) -> (i32, i32) {
    %c0_i32 = arith.constant 0 : i32
    %c0_i32_0 = arith.constant 0 : i32
    %c0_i32_1 = arith.constant 0 : i32
    return %c0_i32, %c0_i32_0 : i32, i32
  }
  func.func @transform_13(%arg0: i32, %arg1: i32) -> (i32, i32, i32) {
    %c0_i32 = arith.constant 0 : i32
    %c0_i32_0 = arith.constant 0 : i32
    return %arg0, %arg1, %c0_i32 : i32, i32, i32
  }
}

</mosaic_0001>

<bundles_post_ra>
// kernel: tpu_custom_call.1
= control target key start
LH: loop header
LB: loop body
LE: loop exit
PB: predicated region body
PF: predicated region fallthrough
CT: control target
= control target key end

     0   :  { %s3264_s0 = inlined_call_operand.hbm [shape: f32[2,16,128], index: 0, kind: input, shape index: {}]   ;;  %s3265_s1 = inlined_call_operand.hbm [shape: bf16[2,16,128], index: 1, kind: input, shape index: {}]   ;;  %s3266_s2 = inlined_call_operand.hbm [shape: bf16[2,16,128], index: 2, kind: input, shape index: {}]   ;;  %s3267_s3 = inlined_call_operand.hbm [shape: bf16[128,128], index: 3, kind: input, shape index: {}]   ;;  %s3268_s4 = inlined_call_operand.vmem [shape: f32[1,128], index: 4, kind: input, shape index: {}]   ;;  %s3269_s5 = inlined_call_operand.hbm [shape: bf16[128,128], index: 5, kind: input, shape index: {}]   ;;  %s3270_s6 = inlined_call_operand.vmem [shape: f32[1,128], index: 6, kind: input, shape index: {}]   ;;  %s3271_s7 = inlined_call_operand.hbm [shape: bf16[128,128], index: 7, kind: input, shape index: {}]   ;;  %s3272_s8 = inlined_call_operand.vmem [shape: f32[1,128], index: 8, kind: input, shape index: {}]   ;;  %s3273_s9 = inlined_call_operand.hbm [shape: bf16[128,128], index: 9, kind: input, shape index: {}]   ;;  %s3274_s10 = inlined_call_operand.vmem [shape: f32[1,128], index: 10, kind: input, shape index: {}]   ;;  %s3275_s11 = inlined_call_operand.vmem [shape: f32[1,128], index: 11, kind: input, shape index: {}]   ;;  %s3276_s12 = inlined_call_operand.vmem [shape: f32[1,128], index: 12, kind: input, shape index: {}]   ;;  %s3277_s13 = inlined_call_operand.hbm [shape: f32[2,16,128], index: 13, kind: output, shape index: {}]  }
   0x1   :  { %3309 = sst [smem:[#allocation32_spill]] %s3265_s1 }
   0x2   :  { %3310 = sst [smem:[#allocation33_spill]] %s3267_s3 }
   0x3   :  { %3311 = sst [smem:[#allocation34_spill]] %s3268_s4 }
   0x4   :  { %3312 = sst [smem:[#allocation35_spill]] %s3270_s6 }
   0x5   :  { %3313 = sst [smem:[#allocation36_spill]] %s3271_s7 }
   0x6   :  { %3314 = sst [smem:[#allocation37_spill]] %s3272_s8 }
   0x7   :  { %3315 = sst [smem:[#allocation38_spill]] %s3274_s10 }
   0x8   :  { %3316 = sst [smem:[#allocation39_spill]] %s3275_s11 }
   0x9   :  { %3317 = sst [smem:[#allocation40_spill]] %s3276_s12 }
   0xa   :  { %3318 = sst [smem:[#allocation41_spill]] %s3277_s13 }
   0xb   :  { %18 = vsyncpa [#allocation5], 0 }
   0xc   :  { %20 = vsyncpa [#allocation5 + $0x1], 0 }
   0xd   :  { %21 = vsyncpa [#allocation8], 0 }
   0xe   :  { %23 = vsyncpa [#allocation8 + $0x1], 0 }
   0xf   :  { %24 = vsyncpa [#allocation11], 0 }
  0x10   :  { %25 = vsyncpa [#allocation14], 0 }
  0x11   :  { %26 = vsyncpa [#allocation6], 0 }
  0x12   :  { %28 = vsyncpa [#allocation6 + $0x1], 0  ;;  %s2696_s25 = smov 0   ;;  %s2698_s26 = smov 0  }
  0x13   :  { %s2700_s27 = smov 0   ;;  %s2702_s28 = smov 0  }
  0x14   :  { %s2704_s29 = smov 0   ;;  %s2706_s30 = smov 0  }
  0x15 LB: > { %3319 = sst [smem:[#allocation22_spill]] %s2585_s25  ;;  %s2727_s14 = sadd.s32 4294967295, %s2605_s30   ;;  %s2605_s30 = sphi %s2706_s30, %s34_s30   ;;  %s2601_s29 = sphi %s2704_s29, %s3378_s29   ;;  %s2597_s28 = sphi %s2702_s28, %s3377_s28   ;;  %s2593_s27 = sphi %s2700_s27, %s3373_s27   ;;  %s2589_s26 = sphi %s2698_s26, %s3376_s26   ;;  %s2585_s25 = sphi %s2696_s25, %s3375_s25  }
  0x16   : > { %3320 = sst [smem:[#allocation23_spill]] %s2593_s27  ;;  %s1838_s15 = sadd.s32 4294967294, %s2605_s30  }
  0x17   : > { %3321 = sst [smem:[#allocation24_spill]] %s2597_s28  ;;  %p68_p0 = scmp.ne.s32.totalorder %s2589_s26, %s2585_s25 }
  0x18   : > { %3322 = sst [smem:[#allocation25_spill]] %s2605_s30  ;;  %p3281_p1 = scmp.eq.s32.totalorder %s2727_s14, 0 }
  0x19   : > { %3323 = sst [smem:[#allocation26_spill]] %s2727_s14  ;;  %p362_p3 = scmp.eq.s32.totalorder %s1838_s15, 1 }
  0x1a   : > { %p2736_p4 = por %p3281_p1, %p68_p0  ;;  %p1839_p5 = scmp.ge.s32.totalorder %s2605_s30, 1 }
  0x1b   : > { %p2741_p6 = por %p362_p3, %p68_p0  ;;  %p369_p7 = scmp.lt.s32.totalorder %s2605_s30, 3 }
  0x1c   : > { %s3324_s16 = scalar_select %p2736_p4, 1, 0 }
  0x1d   : > { %s3326_s17 = scalar_select %p2741_p6, 1, 0 }
  0x1e   : > { %3325 = sst [smem:[#allocation27_spill]] %s3324_s16  ;;  %p2746_p8 = pnand %p1839_p5, %p369_p7 }
  0x1f   : > { %3327 = sst [smem:[#allocation28_spill]] %s3326_s17  ;;  %s2607_s19 = smov [#allocation10]  }
  0x20   : > { %s3328_s18 = scalar_select %p2746_p8, 1, 0 }
  0x21   : > { %s381_s20 = sshll.u32 %s2607_s19, 4  ;;  %p2124_p9 = pneg %p2746_p8  ;;  %s2750_s20 = int_to_ptr.vmem [resolvable:$true] %s381_s20 }
  0x22   : > { %s2608_s22 = smov [#allocation13]   ;;  %s3330_s3 = sld [smem:[#allocation33_spill]] }
  0x23   : > { %p2757_p11 = pnand %p2124_p9, %p3281_p1  ;;  %s413_s23 = sshll.u32 %s2608_s22, 4  ;;  %s2761_s23 = int_to_ptr.vmem [resolvable:$true] %s413_s23 }
  0x25   : > { %s3329_s21 = scalar_select %p2757_p11, 1, 0 }
  0x26   : > { %p2771_p13 = pneg %p2757_p11 }
  0x28   : > { %s2309_s17 = scalar_lea.hbm %s3330_s3, 1024 }
  0x29   : > { %p2310_p12 = scmp.ne.s32.totalorder %s3330_s3, %s2309_s17  ;;  %p2316_p5 = scmp.lt.u32.totalorder %s2309_s17, %s3330_s3 }
  0x2a   : > { %s3331_s13 = scalar_select %p2771_p13, 1, 0 }
  0x2b   : > { %p2312_p0 = pnand %p2771_p13, %p2310_p12 }
  0x2d   : > { %p2313_p3 = pneg %p2312_p0 }
  0x2f   : > { %p2318_p7 = pnand %p2316_p5, %p2313_p3 }
  0x31   : > { %2321 = shalt.err (!%p2318_p7)
}
  0x32   : > { %s2322_s25 = scalar_lea.vmem %s2750_s20, 1024  ;;  %p2330_p2 = scmp.lt.s32.totalorder %s2750_s20, %s2750_s20 }
  0x33   : > { %p2323_p9 = scmp.ne.s32.totalorder %s2750_s20, %s2322_s25  ;;  %p2331_p6 = scmp.lt.s32.totalorder %s2322_s25, %s2322_s25 }
  0x35   : > { %p2325_p10 = pnand %p2323_p9, %p2771_p13  ;;  %p2332_p12 = por %p2331_p6, %p2330_p2 }
  0x37   : > { %p2326_p1 = pneg %p2325_p10 }
  0x39   : > { %p2333_p0 = pnand %p2332_p12, %p2326_p1 }
  0x3b   : > { %2336 = shalt.err (!%p2333_p0)
}
  0x3c   : > { %s3282_s24 = smov 64   ;;  %s3284_s12 = smov 4  }
  0x3d   : > { %2127 = dma.hbm_to_vmem [thread:$0]  (!%p2757_p11), %s3330_s3, 1024, %s2750_s20, [#allocation11], %s3282_s24, %s3282_s24, %s3284_s12  }
  0x3e   : > { %s3332_s7 = sld [smem:[#allocation36_spill]] }
  0x44   : > { %s2337_s25 = scalar_lea.hbm %s3332_s7, 1024 }
  0x45   : > { %p2338_p1 = scmp.ne.s32.totalorder %s3332_s7, %s2337_s25  ;;  %p2344_p10 = scmp.lt.u32.totalorder %s2337_s25, %s3332_s7 }
  0x47   : > { %p2340_p2 = pnand %p2338_p1, %p2771_p13 }
  0x49   : > { %p2341_p6 = pneg %p2340_p2 }
  0x4b   : > { %p2346_p3 = pnand %p2344_p10, %p2341_p6 }
  0x4d   : > { %2349 = shalt.err (!%p2346_p3)
}
  0x4e   : > { %s2350_s20 = scalar_lea.vmem %s2761_s23, 1024  ;;  %p2358_p12 = scmp.lt.s32.totalorder %s2761_s23, %s2761_s23 }
  0x4f   : > { %p2351_p5 = scmp.ne.s32.totalorder %s2761_s23, %s2350_s20  ;;  %p2359_p0 = scmp.lt.s32.totalorder %s2350_s20, %s2350_s20 }
  0x51   : > { %p2353_p7 = pnand %p2351_p5, %p2771_p13  ;;  %p2360_p1 = por %p2359_p0, %p2358_p12 }
  0x53   : > { %p2354_p9 = pneg %p2353_p7 }
  0x55   : > { %p2361_p2 = pnand %p2360_p1, %p2354_p9 }
  0x57   : > { %2364 = shalt.err (!%p2361_p2)
}
  0x58   : > { %2133 = dma.hbm_to_vmem [thread:$0]  (!%p2757_p11), %s3332_s7, 1024, %s2761_s23, [#allocation14], %s3282_s24, %s3282_s24, %s3284_s12  }
  0x59   : > { %s46_s11 = sadd.s32 1, %s2601_s29  ;;  %s55_s28 = sadd.s32 1, %s2593_s27 }
  0x5a   : > { %p48_p6 = scmp.ge.s32.totalorder %s46_s11, 2  ;;  %p62_p10 = scmp.ne.s32.totalorder %s2593_s27, %s2589_s26 }
  0x5b   : > { %p63_p3 = scmp.eq.s32.totalorder %s2605_s30, 0  ;;  %p2155_p5 = scmp.lt.s32.totalorder %s2605_s30, 2 }
  0x5c   : > { %s3380_s11 = smov (%p48_p6, %s46_s11), 0  ;;  %p3334_p9 = scmp.eq.s32.totalorder %s2727_s14, 1 }
  0x5d   : > { %3333 = sst [smem:[#allocation29_spill]] %s3380_s11  ;;  %p64_p7 = por %p63_p3, %p62_p10 }
  0x5e   : > { %p2831_p12 = por %p3334_p9, %p62_p10  ;;  %s50_s15 = ssub.s32 %s2601_s29, %s3380_s11 }
  0x5f   : > { %s2838_s23 = sand.u32 1, %s2593_s27   ;;  %p53_p0 = scmp.eq.s32.totalorder %s50_s15, 0 }
  0x60   : > { %s3335_s17 = scalar_select %p2831_p12, 1, 0 }
  0x61   : > { %p2840_p1 = pnand %p2155_p5, %p64_p7  ;;  %s475_s22 = sand.u32 1, %s2605_s30  }
  0x62   : > { %3336 = sst [smem:[#allocation30_spill]] %s3335_s17  ;;  %s3287_s25 = sshll.u32 %s2838_s23, 3 }
  0x63   : > { %s3337_s19 = scalar_select %p2840_p1, 1, 0 }
  0x64   : > { %s2847_s20 = scalar_select %p53_p0, %s2593_s27, %s55_s28  }
  0x65   : > { %s3288_s8 = sshll.u32 %s2601_s29, 7  ;;  %s3339_s1 = sld [smem:[#allocation32_spill]] }
  0x66   : > { %3338 = sst [smem:[#allocation31_spill]] %s2847_s20  ;;  %s479_s15 = scalar_lea.vmem [#allocation7], %s3287_s25 }
  0x67   : > { %s486_s3 = sshll.u32 %s479_s15, 4  ;;  %s2861_s7 = scalar_lea.sflag [#allocation8], %s475_s22  ;;  %s2859_s3 = int_to_ptr.vmem [resolvable:$true] %s486_s3 }
  0x68   : > { %p2867_p6 = pneg %p2840_p1 }
  0x6a   : > { %s3340_s11 = scalar_select %p2867_p6, 1, 0 }
  0x6b   : > { %s2855_s12 = scalar_lea.hbm %s3339_s1, %s3288_s8  ;;  %s2370_s25 = scalar_lea.hbm %s3339_s1, 256 }
  0x6c   : > { %s2365_s28 = scalar_lea.hbm %s2855_s12, 128  ;;  %p2371_p5 = scmp.lt.u32.totalorder %s2855_s12, %s3339_s1 }
  0x6d   : > { %p2366_p2 = scmp.ne.s32.totalorder %s2855_s12, %s2365_s28  ;;  %p2372_p7 = scmp.lt.u32.totalorder %s2370_s25, %s2365_s28 }
  0x6e   : > { %p2374_p0 = scmp.lt.u32.totalorder %s2365_s28, %s2855_s12 }
  0x6f   : > { %p2368_p10 = pnand %p2867_p6, %p2366_p2  ;;  %p2373_p9 = por %p2372_p7, %p2371_p5 }
  0x71   : > { %p2369_p3 = pneg %p2368_p10  ;;  %p2375_p12 = por %p2374_p0, %p2373_p9 }
  0x73   : > { %p2376_p4 = pnand %p2375_p12, %p2369_p3 }
  0x75   : > { %2379 = shalt.err (!%p2376_p4)
}
  0x76   : > { %s2380_s22 = scalar_lea.vmem %s2859_s3, 128  ;;  %s2611_s24 = smov [#allocation7]  }
  0x77   : > { %p2381_p2 = scmp.ne.s32.totalorder %s2859_s3, %s2380_s22  ;;  %s2385_s10 = sshll.u32 %s2611_s24, 4  ;;  %s2386_s10 = int_to_ptr.vmem [resolvable:$false] %s2385_s10 }
  0x78   : > { %s2387_s8 = scalar_lea.vmem %s2386_s10, 256  ;;  %p2388_p11 = scmp.lt.s32.totalorder %s2859_s3, %s2386_s10 }
  0x79   : > { %p2383_p10 = pnand %p2381_p2, %p2867_p6  ;;  %p2389_p13 = scmp.lt.s32.totalorder %s2387_s8, %s2380_s22 }
  0x7b   : > { %p2384_p8 = pneg %p2383_p10  ;;  %p2390_p5 = por %p2389_p13, %p2388_p11 }
  0x7d   : > { %p2391_p7 = pnand %p2390_p5, %p2384_p8 }
  0x7f   : > { %2394 = shalt.err (!%p2391_p7)
}
  0x80   : > { %s3341_s25 = smov 4   ;;  %s3342_s28 = smov 64  }
  0x81   : > { %2143 = dma.hbm_to_vmem [thread:$0]  (!%p2840_p1), %s2855_s12, 128, %s2859_s3, %s2861_s7, %s3342_s28, %s3342_s28, %s3341_s25  }
  0x82   : > { %s3343_s15 = sshll.u32 %s2601_s29, 7  ;;  %s3344_s10 = sshll.u32 %s2838_s23, 3 }
  0x83   : > { %s2899_s22 = scalar_lea.hbm %s3266_s2, %s3343_s15  ;;  %s500_s8 = scalar_lea.vmem [#allocation9], %s3344_s10 }
  0x84   : > { %s507_s20 = sshll.u32 %s500_s8, 4  ;;  %s2612_s27 = smov [#allocation12]   ;;  %s2903_s20 = int_to_ptr.vmem [resolvable:$true] %s507_s20 }
  0x85   : > { %s397_s30 = sshll.u32 %s2612_s27, 4  ;;  %s2613_s17 = smov [#allocation15]   ;;  %s398_s30 = int_to_ptr.vmem [resolvable:$true] %s397_s30 }
  0x86   : > { %s429_s4 = sshll.u32 %s2613_s17, 4  ;;  %s2395_s3 = scalar_lea.hbm %s3269_s5, 1024  ;;  %s430_s4 = int_to_ptr.vmem [resolvable:$true] %s429_s4 }
  0x87   : > { %p2396_p4 = scmp.ne.s32.totalorder %s3269_s5, %s2395_s3  ;;  %p3345_p8 = scmp.ne.s32.totalorder %s3331_s13, 0 }
  0x88   : > { %p2402_p12 = scmp.lt.u32.totalorder %s2395_s3, %s3269_s5 }
  0x89   : > { %p2398_p11 = pnand %p2396_p4, %p3345_p8 }
  0x8b   : > { %p2399_p13 = pneg %p2398_p11 }
  0x8d   : > { %p2404_p3 = pnand %p2402_p12, %p2399_p13 }
  0x8f   : > { %2407 = shalt.err (!%p2404_p3)
}
  0x90   : > { %s2408_s27 = scalar_lea.vmem %s398_s30, 1024  ;;  %p2416_p10 = scmp.lt.s32.totalorder %s398_s30, %s398_s30 }
  0x91   : > { %p2409_p9 = scmp.ne.s32.totalorder %s398_s30, %s2408_s27  ;;  %p2417_p5 = scmp.lt.s32.totalorder %s2408_s27, %s2408_s27 }
  0x93   : > { %p2411_p0 = pnand %p2409_p9, %p3345_p8  ;;  %p2418_p7 = por %p2417_p5, %p2416_p10 }
  0x95   : > { %p2412_p2 = pneg %p2411_p0 }
  0x97   : > { %p2419_p1 = pnand %p2418_p7, %p2412_p2 }
  0x99   : > { %2422 = shalt.err (!%p2419_p1)
}
  0x9a   : > { %p3346_p4 = scmp.ne.s32.totalorder %s3329_s21, 0  ;;  %s2423_s24 = scalar_lea.hbm %s3273_s9, 1024 }
  0x9b   : > { %p2424_p11 = scmp.ne.s32.totalorder %s3273_s9, %s2423_s24  ;;  %p2430_p12 = scmp.lt.u32.totalorder %s2423_s24, %s3273_s9 }
  0x9c   : > { %2130 = dma.hbm_to_vmem [thread:$0]  (!%p3346_p4), %s3269_s5, 1024, %s398_s30, [#allocation11], %s3342_s28, %s3342_s28, %s3341_s25  }
  0x9d   : > { %p2426_p1 = pnand %p2424_p11, %p3345_p8 }
  0x9f   : > { %p2427_p13 = pneg %p2426_p1 }
  0xa1   : > { %p2432_p3 = pnand %p2430_p12, %p2427_p13 }
  0xa3   : > { %2435 = shalt.err (!%p2432_p3)
}
  0xa4   : > { %s2436_s1 = scalar_lea.vmem %s430_s4, 1024  ;;  %p2444_p10 = scmp.lt.s32.totalorder %s430_s4, %s430_s4 }
  0xa5   : > { %p2437_p9 = scmp.ne.s32.totalorder %s430_s4, %s2436_s1  ;;  %p2445_p5 = scmp.lt.s32.totalorder %s2436_s1, %s2436_s1 }
  0xa7   : > { %p2439_p0 = pnand %p2437_p9, %p3345_p8  ;;  %p2446_p7 = por %p2445_p5, %p2444_p10 }
  0xa9   : > { %p2440_p2 = pneg %p2439_p0 }
  0xab   : > { %p2447_p6 = pnand %p2446_p7, %p2440_p2 }
  0xad   : > { %2450 = shalt.err (!%p2447_p6)
}
  0xae   : > { %2136 = dma.hbm_to_vmem [thread:$0]  (!%p3346_p4), %s3273_s9, 1024, %s430_s4, [#allocation14], %s3342_s28, %s3342_s28, %s3341_s25  }
  0xaf   : > { %s1845_s13 = sshll.u32 %s2838_s23, 4  ;;  %s1916_s27 = sshll.u32 %s2601_s29, 8 }
  0xb0   : > { %s2952_s16 = scalar_lea.hbm %s3264_s0, %s1916_s27  ;;  %s456_s21 = scalar_lea.vmem [#allocation4], %s1845_s13 }
  0xb1   : > { %s465_s17 = sshll.u32 %s456_s21, 4  ;;  %s453_s24 = scalar_lea.sflag [#allocation5], %s2838_s23  ;;  %s2954_s17 = int_to_ptr.vmem [resolvable:$true] %s465_s17 }
  0xb2   : > { %s2451_s10 = scalar_lea.hbm %s2952_s16, 256  ;;  %p3347_p8 = scmp.ne.s32.totalorder %s3340_s11, 0 }
  0xb3   : > { %p2452_p6 = scmp.ne.s32.totalorder %s2952_s16, %s2451_s10  ;;  %s2456_s3 = scalar_lea.hbm %s3264_s0, 512 }
  0xb4   : > { %p2457_p1 = scmp.lt.u32.totalorder %s2952_s16, %s3264_s0  ;;  %p2458_p13 = scmp.lt.u32.totalorder %s2456_s3, %s2451_s10 }
  0xb5   : > { %p2454_p4 = pnand %p2452_p6, %p3347_p8  ;;  %p2460_p3 = scmp.lt.u32.totalorder %s2451_s10, %s2952_s16 }
  0xb6   : > { %p2459_p12 = por %p2458_p13, %p2457_p1 }
  0xb7   : > { %p2455_p11 = pneg %p2454_p4 }
  0xb8   : > { %p2461_p9 = por %p2460_p3, %p2459_p12 }
  0xba   : > { %p2462_p0 = pnand %p2461_p9, %p2455_p11 }
  0xbc   : > { %2465 = shalt.err (!%p2462_p0)
}
  0xbd   : > { %s2466_s30 = scalar_lea.vmem %s2954_s17, 256  ;;  %s2614_s15 = smov [#allocation4]  }
  0xbe   : > { %p2467_p2 = scmp.ne.s32.totalorder %s2954_s17, %s2466_s30  ;;  %s2471_s13 = sshll.u32 %s2614_s15, 4  ;;  %s2472_s13 = int_to_ptr.vmem [resolvable:$false] %s2471_s13 }
  0xbf   : > { %s2473_s27 = scalar_lea.vmem %s2472_s13, 512  ;;  %p2474_p7 = scmp.lt.s32.totalorder %s2954_s17, %s2472_s13 }
  0xc0   : > { %p2469_p10 = pnand %p2467_p2, %p3347_p8  ;;  %p2475_p6 = scmp.lt.s32.totalorder %s2473_s27, %s2466_s30 }
  0xc2   : > { %p2470_p5 = pneg %p2469_p10  ;;  %p2476_p4 = por %p2475_p6, %p2474_p7 }
  0xc4   : > { %p2477_p1 = pnand %p2476_p4, %p2470_p5 }
  0xc6   : > { %2480 = shalt.err (!%p2477_p1)
}
  0xc7   : > { %s2615_s6 = smov 128   ;;  %s2616_s14 = smov 8  }
  0xc8   : > { %p3348_p11 = scmp.ne.s32.totalorder %s3337_s19, 0  ;;  %s2481_s21 = scalar_lea.hbm %s2899_s22, 128 }
  0xc9   : > { %p2482_p13 = scmp.ne.s32.totalorder %s2899_s22, %s2481_s21  ;;  %s2486_s8 = scalar_lea.hbm %s3266_s2, 256 }
  0xca   : > { %2140 = dma.hbm_to_vmem [thread:$0]  (!%p3348_p11), %s2952_s16, 256, %s2954_s17, %s453_s24, %s2615_s6, %s2615_s6, %s2616_s14  }
  0xcb   : > { %p2484_p12 = pnand %p2482_p13, %p3347_p8  ;;  %p2487_p9 = scmp.lt.u32.totalorder %s2899_s22, %s3266_s2 }
  0xcc   : > { %p2488_p0 = scmp.lt.u32.totalorder %s2486_s8, %s2481_s21  ;;  %p2490_p10 = scmp.lt.u32.totalorder %s2481_s21, %s2899_s22 }
  0xcd   : > { %p2485_p3 = pneg %p2484_p12 }
  0xce   : > { %p2489_p2 = por %p2488_p0, %p2487_p9 }
  0xd0   : > { %p2491_p5 = por %p2490_p10, %p2489_p2 }
  0xd2   : > { %p2492_p7 = pnand %p2491_p5, %p2485_p3 }
  0xd4   : > { %2495 = shalt.err (!%p2492_p7)
}
  0xd5   : > { %s2496_s23 = scalar_lea.vmem %s2903_s20, 128  ;;  %s2617_s16 = smov [#allocation9]  }
  0xd6   : > { %p2497_p6 = scmp.ne.s32.totalorder %s2903_s20, %s2496_s23  ;;  %s2501_s17 = sshll.u32 %s2617_s16, 4  ;;  %s2502_s17 = int_to_ptr.vmem [resolvable:$false] %s2501_s17 }
  0xd7   : > { %s2503_s24 = scalar_lea.vmem %s2502_s17, 256  ;;  %p2504_p13 = scmp.lt.s32.totalorder %s2903_s20, %s2502_s17 }
  0xd8   : > { %p2499_p4 = pnand %p2497_p6, %p3347_p8  ;;  %p2505_p12 = scmp.lt.s32.totalorder %s2503_s24, %s2496_s23 }
  0xda   : > { %p2500_p1 = pneg %p2499_p4  ;;  %p2506_p9 = por %p2505_p12, %p2504_p13 }
  0xdc   : > { %p2507_p0 = pnand %p2506_p9, %p2500_p1 }
  0xde   : > { %2510 = shalt.err (!%p2507_p0)
}
  0xdf   : > { %2146 = dma.hbm_to_vmem [thread:$0]  (!%p3348_p11), %s2899_s22, 128, %s2903_s20, %s2861_s7, %s3342_s28, %s3342_s28, %s3341_s25  }
  0xe0   : > { %p3349_p8 = scmp.ne.s32.totalorder %s3328_s18, 0 }
  0xe1   : > { %s3350_s11 = sld [smem:[#allocation27_spill]] (!%p3349_p8)  ;;  %s3008_s1 = sand.u32 (!%p3349_p8), 1, %s2589_s26  }
  0xe2   : > { %519 = sbr.rel (%p3349_p8) target bundleno = 3564 (0xdec), region = 72  ;;  %s1855_s30 = sshll.u32 (!%p3349_p8), %s3008_s1, 4 }
  0xe3   : > { %s522_s15 = scalar_lea.sflag (!%p3349_p8), [#allocation5], %s3008_s1  ;;  %s3014_s19 = scalar_lea.vmem (!%p3349_p8), [#allocation4], %s1855_s30 }
  0xe7   : > { %p3351_p3 = scmp.ne.s32.totalorder (!%p3349_p8), %s3350_s11, 0 }
  0xe9   : > { %2564 = dma.done.wait (%p3351_p3), %s522_s15, 256  }
  0xea   : > { %2566 = vsyncadd (%p3351_p3), %s522_s15, 4294967040  ;;  %s3352_s7 = sld [smem:[#allocation26_spill]]  ;;  %s1856_s20 = sshll.u32 %s3008_s1, 3 }
  0xeb   : > { %s3022_s28 = scalar_lea.vmem [#allocation7], %s1856_s20 }
  0xf0   : > { %s530_s18 = sand.u32 1, %s3352_s7  }
  0xf1   : > { %s531_s25 = scalar_lea.sflag [#allocation8], %s530_s18 }
  0xf2   : > { %2568 = dma.done.wait (%p3351_p3), %s531_s25, 256  }
  0xf3   : > { %2570 = vsyncadd (%p3351_p3), %s531_s25, 4294967040  ;;  %s3028_s22 = scalar_lea.vmem [#allocation9], %s1856_s20  ;;  %p3353_p11 = scmp.eq.s32.totalorder %s3352_s7, 0 }
  0xf5   : > { %2572 = dma.done.wait (%p3353_p11), [#allocation11], 2048   ;;  %p3354_p2 = pmov %p3353_p11 }
  0xf7   : > { %2574 = vsyncadd (%p3354_p2), [#allocation11], 4294965248  ;;  %p3355_p10 = pmov %p3354_p2 }
  0xf8   : > { %p3356_p5 = pmov %p3354_p2 }
  0xf9   : > { %2576 = dma.done.wait (%p3355_p10), [#allocation14], 2048  }
  0xfa   : > { %2578 = vsyncadd (%p3356_p5), [#allocation14], 4294965248  ;;  %v2618_v0 = vmov 0.0   ;;  %vm2619_vm0 = vmmov 0   ;;  %v2239_v1 = vld [vmem:[#allocation12] sm:$0xff]   ;;  %v2240_v2 = vld [vmem:[#allocation12 + $0x8] sm:$0xff]  }
  0xfb   : > { %1972 = vmatprep.subr.bf16.mxu0 %v2618_v0  ;;  %1988 = vmatprep.mubr.msk.bf16.mxu0 %vm2619_vm0, %v2618_v0  ;;  %v2241_v3 = vld [vmem:[#allocation12 + $0x10] sm:$0xff]   ;;  %v2242_v4 = vld [vmem:[#allocation12 + $0x18] sm:$0xff]   ;;  %v2243_v5 = vld [vmem:[#allocation12 + $0x20] sm:$0xff]   ;;  %s3357_s6 = sld [smem:[#allocation35_spill]]  ;;  %vm981_vm1 = vcmask 261120   ;;  %s3358_s10 = sld [smem:[#allocation34_spill]] }
  0xfc   : > { %1992 = vmatprep.subr.bf16.mxu1 %v2618_v0  ;;  %2008 = vmatprep.mubr.msk.bf16.mxu1 %vm2619_vm0, %v2618_v0  ;;  %v2244_v6 = vld [vmem:[#allocation12 + $0x28] sm:$0xff]   ;;  %v2256_v7 = vld [vmem:[#allocation13] sm:$0xff]   ;;  %v2245_v9 = vld [vmem:[#allocation12 + $0x30] sm:$0xff]   ;;  %s3359_s3 = sld [smem:[#allocation37_spill]]  ;;  %vm1029_vm2 = vcmask 130048   ;;  %s2620_s12 = smov 96  }
  0xfd   : > { %1973 = vmatpush3.bf16.msra.mxu0 %v2239_v1  ;;  %1993 = vmatpush3.bf16.msra.mxu1 %v2256_v7  ;;  %v2257_v8 = vld [vmem:[#allocation13 + $0x8] sm:$0xff]   ;;  %v2258_v10 = vld [vmem:[#allocation13 + $0x10] sm:$0xff]   ;;  %v2246_v11 = vld [vmem:[#allocation12 + $0x38] sm:$0xff]   ;;  %s2621_s23 = smov 64   ;;  %s2622_s16 = smov 32   ;;  %vm1489_vm3 = vcmask 523264  }
  0xfe   : > { %1974 = vmatprep.subr.bf16.mxu0 %v2618_v0  ;;  %1994 = vmatprep.subr.bf16.mxu1 %v2618_v0  ;;  %v2259_v12 = vld [vmem:[#allocation13 + $0x18] sm:$0xff]   ;;  %v2247_v13 = vld [vmem:[%s3022_s28] sm:$0xff]   ;;  %v2250_v18 = vld [vmem:[#allocation10 + $0x10] sm:$0xff]   ;;  %vm1492_vm4 = vcmask 785408   ;;  %s3360_s11 = sld [smem:[#allocation38_spill]]  ;;  %s3362_s18 = sld [smem:[#allocation39_spill]] }
  0xff   : > { %v2248_v14 = vld [vmem:[#allocation10] sm:$0xff]   ;;  %v2249_v16 = vld [vmem:[#allocation10 + $0x8] sm:$0xff]   ;;  %v2262_v19 = vld [vmem:[#allocation13 + $0x30] sm:$0xff]   ;;  %s3361_s15 = sld [smem:[#allocation24_spill]]  ;;  %s3363_s28 = sld [smem:[#allocation40_spill]] }
 0x100   : > { %v2260_v15 = vld [vmem:[#allocation13 + $0x20] sm:$0xff]   ;;  %v2261_v17 = vld [vmem:[#allocation13 + $0x28] sm:$0xff]   ;;  %v2251_v20 = vld [vmem:[#allocation10 + $0x18] sm:$0xff]   ;;  %s611_s27 = scalar_lea.vmem [#allocation16], %s1855_s30  ;;  %s1654_s8 = scalar_lea.sflag [#allocation6], %s3008_s1 }
 0x101   : > { %1975 = vmatpush3.bf16.msra.mxu0 %v2240_v2  ;;  %1995 = vmatpush3.bf16.msra.mxu1 %v2257_v8  ;;  %v2263_v21 = vld [vmem:[#allocation13 + $0x38] sm:$0xff]   ;;  %v2252_v22 = vld [vmem:[#allocation10 + $0x20] sm:$0xff]   ;;  %v2253_v23 = vld [vmem:[#allocation10 + $0x28] sm:$0xff]   ;;  %s2623_s30 = smov [#allocation16]  }
 0x102   : > { %1976 = vmatprep.subr.bf16.mxu0 %v2618_v0  ;;  %1996 = vmatprep.subr.bf16.mxu1 %v2618_v0  ;;  %v2254_v24 = vld [vmem:[#allocation10 + $0x30] sm:$0xff]   ;;  %v2255_v25 = vld [vmem:[#allocation10 + $0x38] sm:$0xff]   ;;  %v1863_v30 = vld [vmem:[%s3357_s6] ss:$0 sm:$0xff]  ;;  %s1669_s6 = sshll.u32 %s611_s27, 4  ;;  %s3215_s6 = int_to_ptr.vmem [resolvable:$true] %s1669_s6 }
 0x103   : > { %v3070_v26 = vld [vmem:[%s3014_s19] sm:$0xff]  ;;  %v3073_v27 = vld [vmem:[%s3014_s19 + $0x8] sm:$0xff] }
 0x104   : > { %v865_v28 = vpack.c.bf16 %v3073_v27, %v3070_v26  ;;  %v2264_v29 = vld [vmem:[%s3028_s22] sm:$0xff]   ;;  %v1883_v39 = vld [vmem:[%s3358_s10] ss:$0 sm:$0xff]  ;;  %s3364_s22 = sld [smem:[#allocation30_spill]]  ;;  %s3365_s10 = sld [smem:[#allocation41_spill]] }
 0x105   : > { %1977 = vmatpush3.bf16.msra.mxu0 %v2241_v3  ;;  %1997 = vmatpush3.bf16.msra.mxu1 %v2258_v10  ;;  %v1873_v47 = vld [vmem:[%s3359_s3] ss:$0 sm:$0xff]  ;;  %s1919_s13 = sshll.u32 %s3361_s15, 8  ;;  %s2511_s3 = scalar_lea.vmem %s3215_s6, 256 }
 0x106   : > { %1978 = vmatprep.subr.bf16.mxu0 %v2618_v0  ;;  %1998 = vmatprep.subr.bf16.mxu1 %v2618_v0  ;;  %p2512_p7 = scmp.ne.s32.totalorder %s3215_s6, %s2511_s3 }
 0x109   : > { %1979 = vmatpush3.bf16.msra.mxu0 %v2242_v4  ;;  %1999 = vmatpush3.bf16.msra.mxu1 %v2259_v12 }
 0x10a   : > { %1980 = vmatprep.subr.bf16.mxu0 %v2618_v0  ;;  %2000 = vmatprep.subr.bf16.mxu1 %v2618_v0  ;;  %s3213_s4 = scalar_lea.hbm %s3365_s10, %s1919_s13  ;;  %p3366_p6 = scmp.ne.s32.totalorder %s3364_s22, 0 }
 0x10c   : > { %p2513_p4 = pnand %p2512_p7, %p3366_p6 }
 0x10d   : > { %1981 = vmatpush3.bf16.msra.mxu0 %v2243_v5  ;;  %2001 = vmatpush3.bf16.msra.mxu1 %v2260_v15 }
 0x10e   : > { %1982 = vmatprep.subr.bf16.mxu0 %v2618_v0  ;;  %2002 = vmatprep.subr.bf16.mxu1 %v2618_v0  ;;  %p2514_p1 = pneg %p2513_p4 }
 0x111   : > { %1983 = vmatpush3.bf16.msra.mxu0 %v2244_v6  ;;  %2003 = vmatpush3.bf16.msra.mxu1 %v2261_v17 }
 0x112   : > { %1984 = vmatprep.subr.bf16.mxu0 %v2618_v0  ;;  %2004 = vmatprep.subr.bf16.mxu1 %v2618_v0 }
 0x115   : > { %1985 = vmatpush3.bf16.msra.mxu0 %v2245_v9  ;;  %2005 = vmatpush3.bf16.msra.mxu1 %v2262_v19 }
 0x116   : > { %1986 = vmatprep.subr.bf16.mxu0 %v2618_v0  ;;  %2006 = vmatprep.subr.bf16.mxu1 %v2618_v0 }
 0x119   : > { %1987 = vmatpush3.bf16.msra.mxu0 %v2246_v11  ;;  %2007 = vmatpush3.bf16.msra.mxu1 %v2263_v21 }
 0x11a   : > { %2012 = vmatprep.subr.bf16.mxu0 %v2618_v0  ;;  %2032 = vmatprep.subr.bf16.mxu1 %v2618_v0 }
 0x11c   : > { %1989 = vmatmul.mubr.bf16.vlgmr.msra.gmra.mrb[0].mxu0 %v2247_v13  ;;  %2009 = vmatmul.mubr.bf16.vlgmr.msra.gmra.mrb[0].mxu1 %v2264_v29 }
 0x11d   : > { %2013 = vmatpush3.bf16.msra.mxu0 %v2248_v14  ;;  %2028 = vmatprep.mubr.msk.bf16.mxu0 %vm2619_vm0, %v2618_v0 }
 0x11e   : > { %2014 = vmatprep.subr.bf16.mxu0 %v2618_v0  ;;  %2034 = vmatprep.mubr.msk.bf16.mxu1 %vm2619_vm0, %v2618_v0 }
 0x121   : > { %2015 = vmatpush3.bf16.msra.mxu0 %v2249_v16 }
 0x122   : > { %2016 = vmatprep.subr.bf16.mxu0 %v2618_v0 }
 0x125   : > { %2017 = vmatpush3.bf16.msra.mxu0 %v2250_v18 }
 0x126   : > { %2018 = vmatprep.subr.bf16.mxu0 %v2618_v0 }
 0x129   : > { %2019 = vmatpush3.bf16.msra.mxu0 %v2251_v20 }
 0x12a   : > { %2020 = vmatprep.subr.bf16.mxu0 %v2618_v0 }
 0x12d   : > { %2021 = vmatpush3.bf16.msra.mxu0 %v2252_v22 }
 0x12e   : > { %2022 = vmatprep.subr.bf16.mxu0 %v2618_v0 }
 0x131   : > { %2023 = vmatpush3.bf16.msra.mxu0 %v2253_v23 }
 0x132   : > { %2024 = vmatprep.subr.bf16.mxu0 %v2618_v0 }
 0x135   : > { %2025 = vmatpush3.bf16.msra.mxu0 %v2254_v24 }
 0x136   : > { %2026 = vmatprep.subr.bf16.mxu0 %v2618_v0 }
 0x139   : > { %2027 = vmatpush3.bf16.msra.mxu0 %v2255_v25 }
 0x13a   : > { %2080 = vmatprep.subr.bf16.mxu0 %v2618_v0 }
 0x13c   : > { %2029 = vmatmul.mubr.bf16.vlgmr.msra.gmra.mrb[4].mxu0 %v865_v28 }
 0x13d   : > { %2096 = vmatprep.mubr.msk.bf16.mxu0 %vm2619_vm0, %v2618_v0 }
 0x1ef   : > { %v734_v31 = vpop.f32.mrb[0].mxu0  ;;  %v852_v48 = vpop.f32.mrb[0].mxu1 }
 0x1f0   : > { %v735_v32 = vadd.f32 %v1863_v30, %v734_v31  ;;  %v1990_v33 = vpop.f32.mrb[1].mxu0  ;;  %v853_v49 = vadd.f32 %v1873_v47, %v852_v48  ;;  %v2010_v50 = vpop.f32.mrb[1].mxu1 }
 0x1f1   : > { %v737_v34 = vpop.f32.mrb[2].mxu0  ;;  %v855_v51 = vpop.f32.mrb[2].mxu1 }
 0x1f2   : > { %v738_v35 = vadd.f32 %v1863_v30, %v737_v34  ;;  %v1991_v36 = vpop.f32.mrb[3].mxu0  ;;  %v856_v52 = vadd.f32 %v1873_v47, %v855_v51  ;;  %v2011_v53 = vpop.f32.mrb[3].mxu1 }
 0x1f4   : > { %v3087_v37 = vpack.c.bf16 %v738_v35, %v735_v32  ;;  %v3104_v54 = vpack.c.bf16 %v856_v52, %v853_v49 }
 0x1f6   : > { %v986_v38 = vsel %vm981_vm1, %v3087_v37, 0 }
 0x1f7   : > { %2033 = vmatpush3.bf16.xpose.msra.mxu1 %v986_v38 }
 0x1f8   : > { %2038 = vmatprep.subr.bf16.mxu1 %v2618_v0 }
 0x20f   : > { %v971_v40 = vpop.f32.mrb[4].mxu0 }
 0x210   : > { %v2030_v41 = vpop.f32.mrb[5].mxu0  ;;  %v972_v43 = vadd.f32 %v1883_v39, %v971_v40 }
 0x211   : > { %v974_v42 = vpop.f32.mrb[6].mxu0 }
 0x212   : > { %v975_v44 = vadd.f32 %v1883_v39, %v974_v42  ;;  %v2031_v45 = vpop.f32.mrb[7].mxu0 }
 0x214   : > { %v3095_v46 = vpack.c.bf16 %v975_v44, %v972_v43 }
 0x216   : > { %2035 = vmatmul.mubr.msk.bf16.vlgmr.msra.gmra.mrb[4].mxu1 %vm981_vm1, %v3095_v46 }
 0x217   : > { %2040 = vmatprep.mubr.msk.bf16.mxu1 %vm2619_vm0, %v2618_v0  ;;  %2039 = vmatpush3.bf16.msra.mxu1 %v3104_v54 }
 0x218   : > { %2044 = vmatprep.subr.bf16.mxu1 %v2618_v0 }
 0x2e9   : > { %v1022_v55 = vpop.f32.mrb[4].mxu1 }
 0x2ea   : > { %v2036_v56 = vpop.f32.mrb[5].mxu1  ;;  %v1030_v57 = vsel %vm1029_vm2, %v1022_v55, -inf }
 0x2eb   : > { %1031 = vmax.xlane.f32.xlu0 %v1030_v57  ;;  %v1025_v58 = vpop.f32.mrb[6].mxu1 }
 0x2ec   : > { %v2037_v59 = vpop.f32.mrb[7].mxu1  ;;  %v1033_v60 = vsel %vm1029_vm2, %v1025_v58, -inf }
 0x2ef   : > { %1034 = vmax.xlane.f32.xlu0 %v1033_v60 }
 0x305   : > { %1101 = vrot.lane.b32.xlu0 %v3087_v37, %s2620_s12 }
 0x378   : > { %v1032_v61 = vpop.xlane.xlu0 %1031 }
 0x379   : > { %v1036_v62 = vsub.f32 %v1022_v55, %v1032_v61 }
 0x37b   : > { %v1038_v63 = vmul.f32 1.442695, %v1036_v62 }
 0x37c   : > { %v1035_v1 = vpop.xlane.xlu0 %1034 }
 0x37d   : > { %2273 = vpow2.f32 %v1038_v63  ;;  %v1037_v2 = vsub.f32 %v1025_v58, %v1035_v1 }
 0x37f   : > { %v1040_v3 = vmul.f32 1.442695, %v1037_v2 }
 0x380   : > { %v1102_v14 = vpop.permute.xlu0 %1101 }
 0x381   : > { %2275 = vpow2.f32 %v1040_v3  ;;  %v1107_v16 = vsel %vm981_vm1, %v1102_v14, 0 }
 0x387   : > { %v2274_v4 = vpop.eup %2273 }
 0x388   : > { %v1042_v5 = vsel %vm1029_vm2, %v2274_v4, 0.0 }
 0x389   : > { %1043 = vadd.xlane.f32.xlu1 %v1042_v5 }
 0x38b   : > { %v2276_v6 = vpop.eup %2275 }
 0x38c   : > { %v1045_v7 = vsel %vm1029_vm2, %v2276_v6, 0.0 }
 0x38d   : > { %1046 = vadd.xlane.f32.xlu1 %v1045_v7 }
 0x39e   : > { %1098 = vrot.lane.b32.xlu1 %v3095_v46, %s2620_s12 }
 0x416   : > { %v1044_v8 = vpop.xlane.xlu1 %1043 }
 0x417   : > { %2277 = vrcp.f32 %v1044_v8 }
 0x41a   : > { %v1047_v9 = vpop.xlane.xlu1 %1046 }
 0x41b   : > { %2279 = vrcp.f32 %v1047_v9 }
 0x41e   : > { %v1099_v17 = vpop.permute.xlu1 %1098 }
 0x421   : > { %v2278_v10 = vpop.eup %2277 }
 0x422   : > { %v1050_v12 = vmul.f32 %v2278_v10, %v2274_v4 }
 0x425   : > { %v2280_v11 = vpop.eup %2279 }
 0x426   : > { %v1051_v13 = vmul.f32 %v2280_v11, %v2276_v6 }
 0x428   : > { %v1052_v15 = vpack.c.bf16 %v1051_v13, %v1050_v12 }
 0x42a   : > { %2041 = vmatmul.mubr.msk.bf16.vlgmr.msra.gmra.mrb[8].mxu1 %vm1029_vm2, %v1052_v15 }
 0x42b   : > { %2045 = vmatpush3.bf16.xpose.msra.mxu1 %v1107_v16  ;;  %2046 = vmatprep.mubr.msk.bf16.mxu1 %vm2619_vm0, %v2618_v0 }
 0x42c   : > { %2050 = vmatprep.subr.bf16.mxu1 %v2618_v0 }
 0x432   : > { %2047 = vmatmul.mubr.msk.bf16.vlgmr.msra.gmra.mrb[12].mxu1 %vm981_vm1, %v1099_v17 }
 0x433   : > { %2052 = vmatprep.mubr.msk.bf16.mxu1 %vm2619_vm0, %v2618_v0 }
 0x4fd   : > { %v3124_v18 = vpop.f32.mrb[8].mxu1 }
 0x4fe   : > { %v2042_v19 = vpop.f32.mrb[9].mxu1 }
 0x4ff   : > { %v3126_v20 = vpop.f32.mrb[10].mxu1 }
 0x500   : > { %v2043_v21 = vpop.f32.mrb[11].mxu1 }
 0x505   : > { %v1143_v22 = vpop.f32.mrb[12].mxu1 }
 0x506   : > { %v2048_v23 = vpop.f32.mrb[13].mxu1  ;;  %v1150_v24 = vsel %vm1029_vm2, %v1143_v22, -inf }
 0x507   : > { %1151 = vmax.xlane.f32.xlu1 %v1150_v24  ;;  %v1146_v25 = vpop.f32.mrb[14].mxu1 }
 0x508   : > { %v2049_v28 = vpop.f32.mrb[15].mxu1  ;;  %v1153_v29 = vsel %vm1029_vm2, %v1146_v25, -inf }
 0x509   : > { %1154 = vmax.xlane.f32.xlu0 %v1153_v29 }
 0x594   : > { %v1152_v30 = vpop.xlane.xlu1 %1151 }
 0x595   : > { %v1156_v31 = vsub.f32 %v1143_v22, %v1152_v30 }
 0x596   : > { %v1155_v32 = vpop.xlane.xlu0 %1154 }
 0x597   : > { %v1158_v33 = vmul.f32 1.442695, %v1156_v31  ;;  %v1157_v34 = vsub.f32 %v1146_v25, %v1155_v32 }
 0x599   : > { %2281 = vpow2.f32 %v1158_v33  ;;  %v1160_v35 = vmul.f32 1.442695, %v1157_v34 }
 0x59b   : > { %2283 = vpow2.f32 %v1160_v35 }
 0x5a3   : > { %v2282_v36 = vpop.eup %2281 }
 0x5a4   : > { %v1162_v38 = vsel %vm1029_vm2, %v2282_v36, 0.0 }
 0x5a5   : > { %v2284_v39 = vpop.eup %2283  ;;  %1163 = vadd.xlane.f32.xlu0 %v1162_v38 }
 0x5a6   : > { %v1165_v40 = vsel %vm1029_vm2, %v2284_v39, 0.0 }
 0x5a7   : > { %1166 = vadd.xlane.f32.xlu1 %v1165_v40 }
 0x5b8   : > { %1223 = vrot.lane.b32.xlu1 %v3087_v37, %s2621_s23 }
 0x5bb   : > { %1174 = vrot.lane.b32.xlu0 %v3104_v54, %s2620_s12 }
 0x5bc   : > { %1221 = vrot.lane.b32.xlu1 %v3095_v46, %s2621_s23 }
 0x632   : > { %v1164_v41 = vpop.xlane.xlu0 %1163 }
 0x633   : > { %2285 = vrcp.f32 %v1164_v41 }
 0x634   : > { %v1167_v42 = vpop.xlane.xlu1 %1166 }
 0x635   : > { %2287 = vrcp.f32 %v1167_v42 }
 0x636   : > { %v1175_v43 = vpop.permute.xlu0 %1174 }
 0x637   : > { %2051 = vmatpush3.bf16.msra.mxu1 %v1175_v43 }
 0x638   : > { %2056 = vmatprep.subr.bf16.mxu1 %v2618_v0  ;;  %v1224_v49 = vpop.permute.xlu1 %1223 }
 0x639   : > { %v1229_v51 = vsel %vm981_vm1, %v1224_v49, 0 }
 0x63c   : > { %v1222_v52 = vpop.permute.xlu1 %1221 }
 0x63d   : > { %v2286_v44 = vpop.eup %2285 }
 0x63e   : > { %v1170_v47 = vmul.f32 %v2286_v44, %v2282_v36 }
 0x63f   : > { %v2288_v45 = vpop.eup %2287 }
 0x640   : > { %v1171_v48 = vmul.f32 %v2288_v45, %v2284_v39 }
 0x642   : > { %v1172_v50 = vpack.c.bf16 %v1171_v48, %v1170_v47 }
 0x644   : > { %2053 = vmatmul.mubr.msk.bf16.vlgmr.msra.gmra.mrb[16].mxu1 %vm1029_vm2, %v1172_v50 }
 0x645   : > { %2057 = vmatpush3.bf16.xpose.msra.mxu1 %v1229_v51  ;;  %2058 = vmatprep.mubr.msk.bf16.mxu1 %vm2619_vm0, %v2618_v0 }
 0x646   : > { %2062 = vmatprep.subr.bf16.mxu1 %v2618_v0 }
 0x64c   : > { %2059 = vmatmul.mubr.msk.bf16.vlgmr.msra.gmra.mrb[20].mxu1 %vm981_vm1, %v1222_v52 }
 0x64d   : > { %2064 = vmatprep.mubr.msk.bf16.mxu1 %vm2619_vm0, %v2618_v0 }
 0x717   : > { %v3147_v53 = vpop.f32.mrb[16].mxu1 }
 0x718   : > { %v2054_v55 = vpop.f32.mrb[17].mxu1 }
 0x719   : > { %v3149_v56 = vpop.f32.mrb[18].mxu1 }
 0x71a   : > { %v2224_v57 = vpack.i.bf16 %v3149_v56, %v3147_v53  ;;  %v2055_v58 = vpop.f32.mrb[19].mxu1  ;;  %v2265_v53 = vld [vmem:[#allocation15] sm:$0xff]   ;;  %v2266_v56 = vld [vmem:[#allocation15 + $0x8] sm:$0xff]  }
 0x71b   : > { %2081 = vmatpush3.bf16.msra.mxu0 %v2265_v53 }
 0x71c   : > { %2082 = vmatprep.subr.bf16.mxu0 %v2618_v0 }
 0x71f   : > { %v1265_v59 = vpop.f32.mrb[20].mxu1  ;;  %2083 = vmatpush3.bf16.msra.mxu0 %v2266_v56 }
 0x720   : > { %v2060_v60 = vpop.f32.mrb[21].mxu1  ;;  %v1272_v61 = vsel %vm1029_vm2, %v1265_v59, -inf  ;;  %2084 = vmatprep.subr.bf16.mxu0 %v2618_v0 }
 0x721   : > { %1273 = vmax.xlane.f32.xlu1 %v1272_v61  ;;  %v1268_v62 = vpop.f32.mrb[22].mxu1  ;;  %v2269_v60 = vld [vmem:[#allocation15 + $0x20] sm:$0xff]   ;;  %v2270_v61 = vld [vmem:[#allocation15 + $0x28] sm:$0xff]  }
 0x722   : > { %v2061_v63 = vpop.f32.mrb[23].mxu1  ;;  %v1275_v1 = vsel %vm1029_vm2, %v1268_v62, -inf }
 0x723   : > { %1276 = vmax.xlane.f32.xlu0 %v1275_v1  ;;  %v2272_v63 = vld [vmem:[#allocation15 + $0x38] sm:$0xff]  }
 0x732   : > { %1295 = vrot.lane.b32.xlu1 %v3104_v54, %s2621_s23 }
 0x736   : > { %1342 = vrot.lane.b32.xlu1 %v3095_v46, %s2622_s16 }
 0x7ae   : > { %v1274_v2 = vpop.xlane.xlu1 %1273 }
 0x7af   : > { %v1278_v3 = vsub.f32 %v1265_v59, %v1274_v2 }
 0x7b0   : > { %v1277_v4 = vpop.xlane.xlu0 %1276 }
 0x7b1   : > { %v1280_v5 = vmul.f32 1.442695, %v1278_v3  ;;  %v1279_v6 = vsub.f32 %v1268_v62, %v1277_v4  ;;  %v2271_v62 = vld [vmem:[#allocation15 + $0x30] sm:$0xff]  }
 0x7b2   : > { %v1296_v7 = vpop.permute.xlu1 %1295 }
 0x7b3   : > { %2289 = vpow2.f32 %v1280_v5  ;;  %v1282_v8 = vmul.f32 1.442695, %v1279_v6  ;;  %2063 = vmatpush3.bf16.msra.mxu1 %v1296_v7 }
 0x7b4   : > { %2068 = vmatprep.subr.bf16.mxu1 %v2618_v0 }
 0x7b5   : > { %2291 = vpow2.f32 %v1282_v8 }
 0x7bd   : > { %v2290_v9 = vpop.eup %2289 }
 0x7be   : > { %v1284_v10 = vsel %vm1029_vm2, %v2290_v9, 0.0 }
 0x7bf   : > { %v2292_v11 = vpop.eup %2291  ;;  %1285 = vadd.xlane.f32.xlu0 %v1284_v10 }
 0x7c0   : > { %v1287_v12 = vsel %vm1029_vm2, %v2292_v11, 0.0 }
 0x7c3   : > { %1288 = vadd.xlane.f32.xlu0 %v1287_v12 }
 0x7d9   : > { %1344 = vrot.lane.b32.xlu0 %v3087_v37, %s2622_s16  ;;  %v1343_v37 = vpop.permute.xlu1 %1342 }
 0x84c   : > { %v1286_v46 = vpop.xlane.xlu0 %1285 }
 0x84d   : > { %2293 = vrcp.f32 %v1286_v46 }
 0x850   : > { %v1289_v13 = vpop.xlane.xlu0 %1288 }
 0x851   : > { %2295 = vrcp.f32 %v1289_v13 }
 0x854   : > { %v1345_v19 = vpop.permute.xlu0 %1344 }
 0x855   : > { %v1350_v22 = vsel %vm981_vm1, %v1345_v19, 0 }
 0x857   : > { %v2294_v14 = vpop.eup %2293 }
 0x858   : > { %v1292_v16 = vmul.f32 %v2294_v14, %v2290_v9 }
 0x85b   : > { %v2296_v15 = vpop.eup %2295 }
 0x85c   : > { %v1293_v17 = vmul.f32 %v2296_v15, %v2292_v11 }
 0x85e   : > { %v1294_v21 = vpack.c.bf16 %v1293_v17, %v1292_v16 }
 0x860   : > { %2065 = vmatmul.mubr.msk.bf16.vlgmr.msra.gmra.mrb[24].mxu1 %vm1029_vm2, %v1294_v21 }
 0x861   : > { %2069 = vmatpush3.bf16.xpose.msra.mxu1 %v1350_v22  ;;  %2070 = vmatprep.mubr.msk.bf16.mxu1 %vm2619_vm0, %v2618_v0  ;;  %v1900_v22 = vld [vmem:[%s3360_s11] ss:$0 sm:$0xff] }
 0x862   : > { %2074 = vmatprep.subr.bf16.mxu1 %v2618_v0 }
 0x868   : > { %2071 = vmatmul.mubr.msk.bf16.vlgmr.msra.gmra.mrb[28].mxu1 %vm981_vm1, %v1343_v37 }
 0x869   : > { %2076 = vmatprep.mubr.msk.bf16.mxu1 %vm2619_vm0, %v2618_v0 }
 0x933   : > { %v1335_v23 = vpop.f32.mrb[24].mxu1 }
 0x934   : > { %v2066_v24 = vpop.f32.mrb[25].mxu1 }
 0x935   : > { %v1338_v25 = vpop.f32.mrb[26].mxu1 }
 0x936   : > { %v2229_v28 = vpack.i.bf16 %v1338_v25, %v1335_v23  ;;  %v2067_v29 = vpop.f32.mrb[27].mxu1 }
 0x93b   : > { %v1386_v30 = vpop.f32.mrb[28].mxu1 }
 0x93c   : > { %v2072_v31 = vpop.f32.mrb[29].mxu1  ;;  %v1393_v32 = vsel %vm1029_vm2, %v1386_v30, -inf }
 0x93d   : > { %1394 = vmax.xlane.f32.xlu1 %v1393_v32  ;;  %v1389_v33 = vpop.f32.mrb[30].mxu1 }
 0x93e   : > { %v2073_v34 = vpop.f32.mrb[31].mxu1  ;;  %v1396_v35 = vsel %vm1029_vm2, %v1389_v33, -inf }
 0x93f   : > { %1397 = vmax.xlane.f32.xlu0 %v1396_v35 }
 0x9ca   : > { %v1395_v36 = vpop.xlane.xlu1 %1394 }
 0x9cb   : > { %v1399_v38 = vsub.f32 %v1386_v30, %v1395_v36 }
 0x9cc   : > { %v1398_v39 = vpop.xlane.xlu0 %1397 }
 0x9cd   : > { %v1401_v40 = vmul.f32 1.442695, %v1399_v38  ;;  %v1400_v41 = vsub.f32 %v1389_v33, %v1398_v39 }
 0x9cf   : > { %2297 = vpow2.f32 %v1401_v40  ;;  %v1403_v42 = vmul.f32 1.442695, %v1400_v41 }
 0x9d1   : > { %2299 = vpow2.f32 %v1403_v42 }
 0x9d9   : > { %v2298_v43 = vpop.eup %2297 }
 0x9da   : > { %v1405_v44 = vsel %vm1029_vm2, %v2298_v43, 0.0 }
 0x9db   : > { %v2300_v45 = vpop.eup %2299  ;;  %1406 = vadd.xlane.f32.xlu0 %v1405_v44 }
 0x9dc   : > { %v1408_v47 = vsel %vm1029_vm2, %v2300_v45, 0.0 }
 0x9dd   : > { %1409 = vadd.xlane.f32.xlu1 %v1408_v47  ;;  %v1910_v47 = vld [vmem:[%s3363_s28] ss:$0 sm:$0xff] }
 0x9ee   : > { %2225 = vrot.lane.b32.xlu1 %v2224_v57, %s2622_s16  ;;  %v2268_v57 = vld [vmem:[#allocation15 + $0x18] sm:$0xff]  }
 0x9f1   : > { %1416 = vrot.lane.b32.xlu0 %v3104_v54, %s2622_s16  ;;  %v2267_v54 = vld [vmem:[#allocation15 + $0x10] sm:$0xff]  }
 0x9f2   : > { %2230 = vrot.lane.b32.xlu1 %v2229_v28, %s2621_s23  ;;  %2085 = vmatpush3.bf16.msra.mxu0 %v2267_v54 }
 0x9f3   : > { %2086 = vmatprep.subr.bf16.mxu0 %v2618_v0 }
 0x9f6   : > { %2087 = vmatpush3.bf16.msra.mxu0 %v2268_v57 }
 0x9f7   : > { %2088 = vmatprep.subr.bf16.mxu0 %v2618_v0 }
 0x9fa   : > { %2089 = vmatpush3.bf16.msra.mxu0 %v2269_v60 }
 0x9fb   : > { %2090 = vmatprep.subr.bf16.mxu0 %v2618_v0 }
 0x9fe   : > { %2091 = vmatpush3.bf16.msra.mxu0 %v2270_v61 }
 0x9ff   : > { %2092 = vmatprep.subr.bf16.mxu0 %v2618_v0 }
 0xa02   : > { %2093 = vmatpush3.bf16.msra.mxu0 %v2271_v62 }
 0xa03   : > { %2094 = vmatprep.subr.bf16.mxu0 %v2618_v0 }
 0xa06   : > { %2095 = vmatpush3.bf16.msra.mxu0 %v2272_v63 }
 0xa68   : > { %v1407_v48 = vpop.xlane.xlu0 %1406 }
 0xa69   : > { %2301 = vrcp.f32 %v1407_v48 }
 0xa6a   : > { %v1410_v49 = vpop.xlane.xlu1 %1409 }
 0xa6b   : > { %2303 = vrcp.f32 %v1410_v49 }
 0xa6c   : > { %v1417_v50 = vpop.permute.xlu0 %1416 }
 0xa6d   : > { %2075 = vmatpush3.bf16.msra.mxu1 %v1417_v50 }
 0xa6e   : > { %v2226_v6 = vpop.permute.xlu1 %2225 }
 0xa6f   : > { %v2228_v8 = vunpack.i.h.bf16 %v2226_v6  ;;  %v2227_v9 = vunpack.i.l.bf16 %v2226_v6 }
 0xa71   : > { %v1488_v0 = vsel %vm981_vm1, %v3126_v20, %v2228_v8  ;;  %v1487_v46 = vsel %vm981_vm1, %v3124_v18, %v2227_v9 }
 0xa72   : > { %v2231_v7 = vpop.permute.xlu1 %2230 }
 0xa73   : > { %v2302_v51 = vpop.eup %2301  ;;  %v2233_v10 = vunpack.i.h.bf16 %v2231_v7  ;;  %v2232_v11 = vunpack.i.l.bf16 %v2231_v7 }
 0xa74   : > { %v1413_v55 = vmul.f32 %v2302_v51, %v2298_v43  ;;  %v1909_v43 = vld [vmem:[%s3362_s18] ss:$0 sm:$0xff] }
 0xa75   : > { %v2304_v52 = vpop.eup %2303  ;;  %v1490_v15 = vsel %vm1489_vm3, %v1487_v46, %v2232_v11  ;;  %v1491_v16 = vsel %vm1489_vm3, %v1488_v0, %v2233_v10 }
 0xa76   : > { %v1414_v58 = vmul.f32 %v2304_v52, %v2300_v45 }
 0xa78   : > { %v1415_v59 = vpack.c.bf16 %v1414_v58, %v1413_v55 }
 0xa7a   : > { %2077 = vmatmul.mubr.msk.bf16.vlgmr.msra.gmra.mrb[32].mxu1 %vm1029_vm2, %v1415_v59 }
 0xb4d   : > { %v1456_v1 = vpop.f32.mrb[32].mxu1 }
 0xb4e   : > { %v2078_v2 = vpop.f32.mrb[33].mxu1 }
 0xb4f   : > { %v1459_v3 = vpop.f32.mrb[34].mxu1 }
 0xb50   : > { %v2234_v4 = vpack.i.bf16 %v1459_v3, %v1456_v1  ;;  %v2079_v5 = vpop.f32.mrb[35].mxu1 }
 0xb52   : > { %2235 = vrot.lane.b32.xlu1 %v2234_v4, %s2620_s12  ;;  %s2515_s12 = sshll.u32 %s2623_s30, 4  ;;  %s2516_s12 = int_to_ptr.vmem [resolvable:$false] %s2515_s12 }
 0xb53   : > { %s2517_s23 = scalar_lea.vmem %s2516_s12, 512  ;;  %p2518_p13 = scmp.lt.s32.totalorder %s3215_s6, %s2516_s12 }
 0xb54   : > { %p2519_p12 = scmp.lt.s32.totalorder %s2517_s23, %s2511_s3 }
 0xb56   : > { %p2520_p9 = por %p2519_p12, %p2518_p13 }
 0xb58   : > { %p2521_p0 = pnand %p2520_p9, %p2514_p1 }
 0xbc4   : > { %v2236_v12 = vpop.permute.xlu1 %2235 }
 0xbc5   : > { %v2238_v13 = vunpack.i.h.bf16 %v2236_v12  ;;  %v2237_v14 = vunpack.i.l.bf16 %v2236_v12 }
 0xbc7   : > { %v1494_v17 = vsel %vm1492_vm4, %v1491_v16, %v2238_v13  ;;  %v1493_v19 = vsel %vm1492_vm4, %v1490_v15, %v2237_v14 }
 0xbc8   : > { %v1495_v21 = vpack.c.bf16 %v1494_v17, %v1493_v19 }
 0xbca   : > { %2097 = vmatmul.mubr.bf16.vlgmr.msra.gmra.mrb[8].mxu0 %v1495_v21 }
 0xc9d   : > { %v1601_v37 = vpop.f32.mrb[8].mxu0 }
 0xc9e   : > { %v1602_v23 = vadd.f32 %v1900_v22, %v1601_v37  ;;  %v2098_v24 = vpop.f32.mrb[9].mxu0 }
 0xc9f   : > { %v1604_v25 = vpop.f32.mrb[10].mxu0 }
 0xca0   : > { %v1605_v20 = vadd.f32 %v1900_v22, %v1604_v25  ;;  %v2099_v28 = vpop.f32.mrb[11].mxu0  ;;  %v1608_v18 = vadd.f32 %v1602_v23, %v3070_v26 }
 0xca2   : > { %1610 = vadd.xlane.f32.xlu0 %v1608_v18  ;;  %v1609_v29 = vadd.f32 %v1605_v20, %v3073_v27 }
 0xca4   : > { %1612 = vadd.xlane.f32.xlu1 %v1609_v29 }
 0xd2f   : > { %v1611_v30 = vpop.xlane.xlu0 %1610 }
 0xd30   : > { %v1615_v31 = vmul.f32 0.0078125, %v1611_v30 }
 0xd31   : > { %v1613_v32 = vpop.xlane.xlu1 %1612 }
 0xd32   : > { %v1617_v33 = vsub.f32 %v1608_v18, %v1615_v31  ;;  %v1616_v34 = vmul.f32 0.0078125, %v1613_v32 }
 0xd34   : > { %v1618_v35 = vsub.f32 %v1609_v29, %v1616_v34  ;;  %v1619_v36 = vmul.f32 %v1617_v33, %v1617_v33 }
 0xd36   : > { %1621 = vadd.xlane.f32.xlu0 %v1619_v36  ;;  %v1620_v38 = vmul.f32 %v1618_v35, %v1618_v35 }
 0xd3a   : > { %1623 = vadd.xlane.f32.xlu0 %v1620_v38 }
 0xdc3   : > { %v1622_v39 = vpop.xlane.xlu0 %1621 }
 0xdc4   : > { %v1625_v40 = vmul.f32 0.0078125, %v1622_v39 }
 0xdc6   : > { %v1627_v41 = vadd.f32 1e-05, %v1625_v40 }
 0xdc7   : > { %v1624_v26 = vpop.xlane.xlu0 %1623 }
 0xdc8   : > { %2305 = vrsqrt.f32 %v1627_v41  ;;  %v1626_v42 = vmul.f32 0.0078125, %v1624_v26 }
 0xdca   : > { %v1628_v27 = vadd.f32 1e-05, %v1626_v42 }
 0xdcc   : > { %2307 = vrsqrt.f32 %v1628_v27 }
 0xdd2   : > { %v2306_v44 = vpop.eup %2305 }
 0xdd3   : > { %v1638_v45 = vmul.f32 %v2306_v44, %v1909_v43 }
 0xdd5   : > { %v1640_v48 = vmul.f32 %v1638_v45, %v1617_v33 }
 0xdd6   : > { %v2308_v49 = vpop.eup %2307 }
 0xdd7   : > { %v1649_v50 = vadd.f32 %v1910_v47, %v1640_v48  ;;  %v1639_v51 = vmul.f32 %v2308_v49, %v1909_v43 }
 0xdd9   : > { %v1641_v52 = vmul.f32 %v1639_v51, %v1618_v35  ;;  %1651 = vst [vmem:[%s611_s27] sm:$0xff] %v1649_v50 }
 0xddb   : > { %v1650_v55 = vadd.f32 %v1910_v47, %v1641_v52 }
 0xddd   : > { %1652 = vst [vmem:[%s611_s27 + $0x8] sm:$0xff] %v1650_v55 }
 0xdde   : > { %2524 = shalt.err (!%p2521_p0)
}
 0xddf   : > { %s2525_s16 = scalar_lea.hbm %s3213_s4, 256  ;;  %s2529_s11 = scalar_lea.hbm %s3365_s10, 512 }
 0xde0   : > { %p2526_p8 = scmp.ne.s32.totalorder %s3213_s4, %s2525_s16  ;;  %p2530_p2 = scmp.lt.u32.totalorder %s3213_s4, %s3365_s10 }
 0xde1   : > { %p2531_p10 = scmp.lt.u32.totalorder %s2529_s11, %s2525_s16  ;;  %p2533_p7 = scmp.lt.u32.totalorder %s2525_s16, %s3213_s4 }
 0xde2   : > { %p2527_p3 = pnand %p2526_p8, %p3366_p6 }
 0xde3   : > { %p2532_p5 = por %p2531_p10, %p2530_p2 }
 0xde4   : > { %p2528_p11 = pneg %p2527_p3 }
 0xde5   : > { %p2534_p4 = por %p2533_p7, %p2532_p5 }
 0xde7   : > { %p2535_p1 = pnand %p2534_p4, %p2528_p11 }
 0xde9   : > { %2538 = shalt.err (!%p2535_p1)
}
 0xdea   : > { %s2624_s7 = smov 128   ;;  %s2625_s18 = smov 8  }
 0xdeb   : > { %2122 = dma.vmem_to_hbm [thread:$0]  (%p3366_p6), %s3215_s6, 256, %s3213_s4, %s1654_s8, %s2624_s7, %s2624_s7, %s2625_s18  }
 0xdec PF: > { %s3367_s20 = sld [smem:[#allocation22_spill]]  ;;  %s3368_s25 = sld [smem:[#allocation28_spill]] }
 0xded   : > { %s3369_s28 = sld [smem:[#allocation25_spill]] }
 0xdf2   : > { %s1684_s13 = sand.u32 1, %s3367_s20   ;;  %p3370_p13 = scmp.ne.s32.totalorder %s3368_s25, 0 }
 0xdf3   : > { %p3371_p12 = scmp.ge.s32.totalorder %s3369_s28, 2  ;;  %s1685_s27 = scalar_lea.sflag [#allocation6], %s1684_s13 }
 0xdf5   : > { %p2148_p9 = pnand %p3371_p12, %p3370_p13 }
 0xdf7   : > { %2580 = dma.done.wait (!%p2148_p9), %s1685_s27, 256  }
 0xdf8   : > { %2582 = vsyncadd (!%p2148_p9), %s1685_s27, 4294967040  ;;  %s34_s30 = sadd.s32 1, %s3369_s28   ;;  %s3372_s14 = sld [smem:[#allocation23_spill]] }
 0xdf9   : > { %p31_p0 = scmp.ge.s32.totalorder %s34_s30, 4   ;;  %s3373_s27 = sld [smem:[#allocation31_spill]] }
 0xdfa   : > { %s3374_s1 = sld [smem:[#allocation29_spill]]  ;;  %s3375_s25 = smov %s2589_s26 }
 0xdfb   : > { %s3377_s28 = smov %s2601_s29  ;;  %33 = sbr.rel (!%p31_p0) target bundleno = 21 (0x15), region = 161 }
 0xdfe   : > { %s3376_s26 = smov %s3372_s14 }
 0xe00   : > { %s3378_s29 = smov %s3374_s1 }
 0xe02   :  { %1690 = vsyncpa [#allocation5], 1 }
 0xe03   :  { %1692 = vsyncpa [#allocation5 + $0x1], 1 }
 0xe04   :  { %1693 = vsyncpa [#allocation8], 1 }
 0xe05   :  { %1695 = vsyncpa [#allocation8 + $0x1], 1 }
 0xe06   :  { %1696 = vsyncpa [#allocation11], 1 }
 0xe07   :  { %1697 = vsyncpa [#allocation14], 1 }
 0xe08   :  { %1698 = vsyncpa [#allocation6], 1 }
 0xe09   :  { %1700 = vsyncpa [#allocation6 + $0x1], 1 }

</bundles_post_ra>
